<compile_context>
chip_gen: v7x
topology: tpu7x:2x2x1
jax: 0.10.0
libtpu: 0.0.40
codegen_flags: <defaults>
</compile_context>

<pallas_src>
import functools

import jax
import jax.numpy as jnp
from jax.experimental import pallas as pl
from jax.experimental.pallas import tpu as pltpu


def _round_up(x, m):
    return ((x + m - 1) // m) * m


def _conv_bn_relu_kernel(x_ref, w_ref, s_ref, b_ref, o_ref, *, Wp, TR, RC, KS):
    """One (image, Cout-tile, row-tile) grid step.

    x_ref : (Hp*Wp, Cin)      flat zero-padded image (resident across j, r)
    w_ref : (KS, KS, Cin, TC) conv weights (Cout tile), unscaled
    s_ref : (1, TC) f32       BN scale  = gamma / sqrt(var + eps)
    b_ref : (1, TC) f32       BN bias   = beta - mean * scale
    o_ref : (TR*Wp, TC)       output row-tile (padded width, lane-dense)
    """
    r = pl.program_id(2)
    h0 = r * TR                      # first output image row of this row tile
    CM = RC * Wp                     # flat rows per accumulation chunk
    n_chunks = TR // RC              # small by construction (<= 4 by default)

    scale = s_ref[...]               # (1, TC) f32
    bias = b_ref[...]                # (1, TC) f32

    for c in range(n_chunks):        # static unroll
        base = pl.multiple_of((h0 + c * RC) * Wp, 8)
        acc = None
        for ky in range(KS):
            row0 = pl.multiple_of(base + ky * Wp, 8)
            for kx in range(KS):
                patch = x_ref[pl.ds(row0 + kx, CM), :]            # (CM, Cin)
                d = jnp.dot(patch, w_ref[ky, kx, :, :],
                            preferred_element_type=jnp.float32)   # (CM, TC)
                acc = d if acc is None else acc + d
        # Epilogue: BN scale/bias in f32, ReLU, single lane-dense store.
        y = jnp.maximum(acc * scale + bias, 0.0)
        o_ref[pl.ds(c * CM, CM), :] = y.astype(o_ref.dtype)


def conv_bn_relu(x_nchw, weight_oihw, gamma, beta, running_mean, running_var,
                 *, ks=3, stride=1, padding=1, eps=1e-5,
                 cout_tile=128, row_tile=None, operand_dtype=None):
    assert stride == 1, "kernel implements stride=1 (module default)"
    assert 2 * padding == ks - 1, "kernel implements 'same' conv (module default)"
    N, Cin, H, W = x_nchw.shape
    Cout = weight_oihw.shape[0]
    op_dtype = operand_dtype or x_nchw.dtype      # bf16 here is a perf option
    out_dtype = x_nchw.dtype

    # ---- eval-mode BN as f32 epilogue coefficients --------------------------
    scale = (gamma / jnp.sqrt(running_var + eps)).astype(jnp.float32)
    bias = (beta - running_mean * scale).astype(jnp.float32)

    # ---- lane/sublane-friendly tiling ---------------------------------------
    tc = cout_tile                                # 128 = safe on v5e/v6e/v7x
    CoutP = _round_up(Cout, tc)                   # lane-dense output channels
    Wp = _round_up(W + 2 * padding, 8)            # sublane-aligned padded width

    if row_tile is None:                          # ~<=1024 flat rows per step
        row_tile = max(1, min(H, 1024 // Wp))
    TR = min(row_tile, H)                         # output image rows per step
    Hout_p = _round_up(H, TR)                     # grid-tiled output rows
    Hp = Hout_p + ks                              # guard rows keep the shifted
                                                  # flat tap windows in-bounds
    RC = max(1, min(TR, 256 // Wp))               # image rows per in-kernel chunk
    while TR % RC:
        RC -= 1

    # weights (Cout, Cin, KH, KW) -> (KH, KW, Cin, CoutP), unscaled
    w_p = jnp.transpose(weight_oihw, (2, 3, 1, 0))
    w_p = jnp.pad(w_p, ((0, 0), (0, 0), (0, 0), (0, CoutP - Cout))).astype(op_dtype)
    s_p = jnp.pad(scale, (0, CoutP - Cout)).reshape(1, CoutP)
    b_p = jnp.pad(bias, (0, CoutP - Cout)).reshape(1, CoutP)

    # NCHW -> NHWC, zero spatial pad, flatten rows (free row-major view).
    x_nhwc = jnp.transpose(x_nchw, (0, 2, 3, 1)).astype(op_dtype)
    x_pad = jnp.pad(x_nhwc, ((0, 0),
                             (padding, Hp - H - padding),
                             (padding, Wp - W - padding),
                             (0, 0)))
    x_flat = x_pad.reshape(N, Hp * Wp, Cin)

    n_ct = CoutP // tc
    n_rt = Hout_p // TR

    kernel = functools.partial(_conv_bn_relu_kernel, Wp=Wp, TR=TR, RC=RC, KS=ks)

    isz = jnp.dtype(op_dtype).itemsize
    osz = jnp.dtype(out_dtype).itemsize
    cost = pl.CostEstimate(
        flops=2 * N * H * W * ks * ks * Cin * Cout,
        transcendentals=0,
        bytes_accessed=(N * Hp * Wp * Cin * isz
                        + ks * ks * Cin * CoutP * isz
                        + 2 * CoutP * 4
                        + N * Hout_p * Wp * CoutP * osz))

    # Tile-derived VMEM budget (resident input slab + double-buffered weights
    # and output block + chunk working set), with headroom; cap at 64 MiB so it
    # stays inside v7x physical VMEM.
    vmem_est = (2 * Hp * Wp * Cin * isz
                + 2 * ks * ks * Cin * tc * isz
                + 4 * tc * 4
                + 2 * TR * Wp * tc * osz
                + 4 * RC * Wp * tc * 4)
    vmem_limit = int(min(64 * 1024 * 1024, max(16 * 1024 * 1024, 2 * vmem_est)))

    out_flat = pl.pallas_call(
        kernel,
        out_shape=jax.ShapeDtypeStruct((N, Hout_p * Wp, CoutP), out_dtype),
        grid_spec=pltpu.PrefetchScalarGridSpec(
            num_scalar_prefetch=0,
            grid=(N, n_ct, n_rt),
            in_specs=[
                # flat image slab: resident across Cout-tile and row-tile axes
                pl.BlockSpec((None, Hp * Wp, Cin), lambda n, j, r: (n, 0, 0)),
                pl.BlockSpec((ks, ks, Cin, tc), lambda n, j, r: (0, 0, 0, j)),
                pl.BlockSpec((1, tc), lambda n, j, r: (0, j)),
                pl.BlockSpec((1, tc), lambda n, j, r: (0, j)),
            ],
            out_specs=pl.BlockSpec((None, TR * Wp, tc),
                                   lambda n, j, r: (n, r, j)),
        ),
        compiler_params=pltpu.CompilerParams(
            dimension_semantics=("parallel", "parallel", "parallel"),
            vmem_limit_bytes=vmem_limit),
        cost_estimate=cost,
    )(x_flat, w_p, s_p, b_p)

    # Crop pad rows / pad cols / pad channels, back to PyTorch NCHW convention.
    out = out_flat.reshape(N, Hout_p, Wp, CoutP)[:, :H, :W, :Cout]
    return jnp.transpose(out, (0, 3, 1, 2))


def _reference(x_nchw, weight_oihw, gamma, beta, running_mean, running_var,
               *, padding=1, eps=1e-5):
    # plain-JAX reference (lax conv) for sanity checking the kernel
    y = jax.lax.conv_general_dilated(
        x_nchw, weight_oihw, window_strides=(1, 1),
        padding=((padding, padding), (padding, padding)),
        dimension_numbers=("NCHW", "OIHW", "NCHW"))
    scale = gamma / jnp.sqrt(running_var + eps)
    bias = beta - running_mean * scale
    y = y * scale[None, :, None, None] + bias[None, :, None, None]
    return jnp.maximum(y, 0.0)


if __name__ == "__main__":
    key = jax.random.PRNGKey(0)
    k_x, k_w, k_g, k_b, k_m, k_v = jax.random.split(key, 6)

    N, Cin, H, W = 2, 4, 16, 16
    Cout, KS = 8, 3

    x = jax.random.normal(k_x, (N, Cin, H, W), dtype=jnp.float32)
    weight = jax.random.normal(k_w, (Cout, Cin, KS, KS), dtype=jnp.float32) * 0.1
    gamma = jax.random.normal(k_g, (Cout,), dtype=jnp.float32) * 0.1 + 1.0
    beta = jax.random.normal(k_b, (Cout,), dtype=jnp.float32) * 0.1
    running_mean = jax.random.normal(k_m, (Cout,), dtype=jnp.float32) * 0.1
    running_var = jax.random.uniform(k_v, (Cout,), dtype=jnp.float32,
                                     minval=0.5, maxval=1.5)

    out = conv_bn_relu(x, weight, gamma, beta, running_mean, running_var,
                       ks=KS, stride=1, padding=1)
    out = jax.block_until_ready(out)

    ref = _reference(x, weight, gamma, beta, running_mean, running_var)
    assert out.shape == (N, Cout, H, W)
    assert jnp.allclose(out, ref, atol=1e-4, rtol=1e-4), "mismatch vs reference"

    print("KERNEL_OK")
</pallas_src>

<mosaic_0001>
module attributes {stable_mosaic.version = 11 : i64} {
  func.func @_conv_bn_relu_kernel(%arg0: i32, %arg1: i32, %arg2: i32, %arg3: memref<1x456x4xf32, #tpu.memory_space<vmem>>, %arg4: memref<3x3x4x128xf32, #tpu.memory_space<vmem>>, %arg5: memref<1x128xf32, #tpu.memory_space<vmem>>, %arg6: memref<1x128xf32, #tpu.memory_space<vmem>>, %arg7: memref<1x384x128xf32, #tpu.memory_space<vmem>>) attributes {dimension_semantics = [#tpu.dimension_semantics<parallel>, #tpu.dimension_semantics<parallel>, #tpu.dimension_semantics<parallel>], iteration_bounds = array<i64: 2, 1, 1>, scalar_prefetch = 0 : i64, scratch_operands = 0 : i64, tpu.core_type = #tpu.core_type<tc>, window_params = [{transform_indices = @transform_0, window_bounds = array<i64: 1, 456, 4>}, {transform_indices = @transform_1, window_bounds = array<i64: 3, 3, 4, 128>}, {transform_indices = @transform_2, window_bounds = array<i64: 1, 128>}, {transform_indices = @transform_3, window_bounds = array<i64: 1, 128>}, {transform_indices = @transform_4, window_bounds = array<i64: 1, 384, 128>}]} {
    %c16_i32 = arith.constant 16 : i32
    %0 = arith.muli %arg2, %c16_i32 : i32
    %c0 = arith.constant 0 : index
    %c0_0 = arith.constant 0 : index
    %1 = vector.load %arg5[%c0, %c0_0] : memref<1x128xf32, #tpu.memory_space<vmem>>, vector<1x128xf32>
    %c0_1 = arith.constant 0 : index
    %c0_2 = arith.constant 0 : index
    %2 = vector.load %arg6[%c0_1, %c0_2] : memref<1x128xf32, #tpu.memory_space<vmem>>, vector<1x128xf32>
    %c0_i32 = arith.constant 0 : i32
    %3 = arith.addi %0, %c0_i32 : i32
    %c24_i32 = arith.constant 24 : i32
    %4 = arith.muli %3, %c24_i32 : i32
    %5 = tpu.assume_multiple %4, 8 : i32
    %c0_i32_3 = arith.constant 0 : i32
    %6 = arith.addi %5, %c0_i32_3 : i32
    %7 = tpu.assume_multiple %6, 8 : i32
    %c0_i32_4 = arith.constant 0 : i32
    %8 = arith.addi %7, %c0_i32_4 : i32
    %c0_5 = arith.constant 0 : index
    %9 = arith.index_cast %8 : i32 to index
    %c0_6 = arith.constant 0 : index
    %10 = vector.load %arg3[%c0_5, %9, %c0_6] : memref<1x456x4xf32, #tpu.memory_space<vmem>>, vector<1x192x4xf32>
    %11 = vector.shape_cast %10 : vector<1x192x4xf32> to vector<192x4xf32>
    %c0_7 = arith.constant 0 : index
    %c0_8 = arith.constant 0 : index
    %c0_9 = arith.constant 0 : index
    %c0_10 = arith.constant 0 : index
    %12 = vector.load %arg4[%c0_7, %c0_8, %c0_9, %c0_10] : memref<3x3x4x128xf32, #tpu.memory_space<vmem>>, vector<1x1x4x128xf32>
    %13 = vector.shape_cast %12 : vector<1x1x4x128xf32> to vector<4x128xf32>
    %cst = arith.constant dense<0.000000e+00> : vector<192x128xf32>
    %14 = tpu.matmul %11, %13, %cst {dimension_numbers = #tpu.dot_dimension_numbers<[1], [0], [0], [1], [0, 0, 1, 1], [], []>} : vector<192x4xf32>, vector<4x128xf32>, vector<192x128xf32> -> vector<192x128xf32>
    %c1_i32 = arith.constant 1 : i32
    %15 = arith.addi %7, %c1_i32 : i32
    %c0_11 = arith.constant 0 : index
    %16 = arith.index_cast %15 : i32 to index
    %c0_12 = arith.constant 0 : index
    %17 = vector.load %arg3[%c0_11, %16, %c0_12] : memref<1x456x4xf32, #tpu.memory_space<vmem>>, vector<1x192x4xf32>
    %18 = vector.shape_cast %17 : vector<1x192x4xf32> to vector<192x4xf32>
    %c0_13 = arith.constant 0 : index
    %c1 = arith.constant 1 : index
    %c0_14 = arith.constant 0 : index
    %c0_15 = arith.constant 0 : index
    %19 = vector.load %arg4[%c0_13, %c1, %c0_14, %c0_15] : memref<3x3x4x128xf32, #tpu.memory_space<vmem>>, vector<1x1x4x128xf32>
    %20 = vector.shape_cast %19 : vector<1x1x4x128xf32> to vector<4x128xf32>
    %cst_16 = arith.constant dense<0.000000e+00> : vector<192x128xf32>
    %21 = tpu.matmul %18, %20, %cst_16 {dimension_numbers = #tpu.dot_dimension_numbers<[1], [0], [0], [1], [0, 0, 1, 1], [], []>} : vector<192x4xf32>, vector<4x128xf32>, vector<192x128xf32> -> vector<192x128xf32>
    %22 = arith.addf %14, %21 : vector<192x128xf32>
    %c2_i32 = arith.constant 2 : i32
    %23 = arith.addi %7, %c2_i32 : i32
    %c0_17 = arith.constant 0 : index
    %24 = arith.index_cast %23 : i32 to index
    %c0_18 = arith.constant 0 : index
    %25 = vector.load %arg3[%c0_17, %24, %c0_18] : memref<1x456x4xf32, #tpu.memory_space<vmem>>, vector<1x192x4xf32>
    %26 = vector.shape_cast %25 : vector<1x192x4xf32> to vector<192x4xf32>
    %c0_19 = arith.constant 0 : index
    %c2 = arith.constant 2 : index
    %c0_20 = arith.constant 0 : index
    %c0_21 = arith.constant 0 : index
    %27 = vector.load %arg4[%c0_19, %c2, %c0_20, %c0_21] : memref<3x3x4x128xf32, #tpu.memory_space<vmem>>, vector<1x1x4x128xf32>
    %28 = vector.shape_cast %27 : vector<1x1x4x128xf32> to vector<4x128xf32>
    %cst_22 = arith.constant dense<0.000000e+00> : vector<192x128xf32>
    %29 = tpu.matmul %26, %28, %cst_22 {dimension_numbers = #tpu.dot_dimension_numbers<[1], [0], [0], [1], [0, 0, 1, 1], [], []>} : vector<192x4xf32>, vector<4x128xf32>, vector<192x128xf32> -> vector<192x128xf32>
    %30 = arith.addf %22, %29 : vector<192x128xf32>
    %c24_i32_23 = arith.constant 24 : i32
    %31 = arith.addi %5, %c24_i32_23 : i32
    %32 = tpu.assume_multiple %31, 8 : i32
    %c0_i32_24 = arith.constant 0 : i32
    %33 = arith.addi %32, %c0_i32_24 : i32
    %c0_25 = arith.constant 0 : index
    %34 = arith.index_cast %33 : i32 to index
    %c0_26 = arith.constant 0 : index
    %35 = vector.load %arg3[%c0_25, %34, %c0_26] : memref<1x456x4xf32, #tpu.memory_space<vmem>>, vector<1x192x4xf32>
    %36 = vector.shape_cast %35 : vector<1x192x4xf32> to vector<192x4xf32>
    %c1_27 = arith.constant 1 : index
    %c0_28 = arith.constant 0 : index
    %c0_29 = arith.constant 0 : index
    %c0_30 = arith.constant 0 : index
    %37 = vector.load %arg4[%c1_27, %c0_28, %c0_29, %c0_30] : memref<3x3x4x128xf32, #tpu.memory_space<vmem>>, vector<1x1x4x128xf32>
    %38 = vector.shape_cast %37 : vector<1x1x4x128xf32> to vector<4x128xf32>
    %cst_31 = arith.constant dense<0.000000e+00> : vector<192x128xf32>
    %39 = tpu.matmul %36, %38, %cst_31 {dimension_numbers = #tpu.dot_dimension_numbers<[1], [0], [0], [1], [0, 0, 1, 1], [], []>} : vector<192x4xf32>, vector<4x128xf32>, vector<192x128xf32> -> vector<192x128xf32>
    %40 = arith.addf %30, %39 : vector<192x128xf32>
    %c1_i32_32 = arith.constant 1 : i32
    %41 = arith.addi %32, %c1_i32_32 : i32
    %c0_33 = arith.constant 0 : index
    %42 = arith.index_cast %41 : i32 to index
    %c0_34 = arith.constant 0 : index
    %43 = vector.load %arg3[%c0_33, %42, %c0_34] : memref<1x456x4xf32, #tpu.memory_space<vmem>>, vector<1x192x4xf32>
    %44 = vector.shape_cast %43 : vector<1x192x4xf32> to vector<192x4xf32>
    %c1_35 = arith.constant 1 : index
    %c1_36 = arith.constant 1 : index
    %c0_37 = arith.constant 0 : index
    %c0_38 = arith.constant 0 : index
    %45 = vector.load %arg4[%c1_35, %c1_36, %c0_37, %c0_38] : memref<3x3x4x128xf32, #tpu.memory_space<vmem>>, vector<1x1x4x128xf32>
    %46 = vector.shape_cast %45 : vector<1x1x4x128xf32> to vector<4x128xf32>
    %cst_39 = arith.constant dense<0.000000e+00> : vector<192x128xf32>
    %47 = tpu.matmul %44, %46, %cst_39 {dimension_numbers = #tpu.dot_dimension_numbers<[1], [0], [0], [1], [0, 0, 1, 1], [], []>} : vector<192x4xf32>, vector<4x128xf32>, vector<192x128xf32> -> vector<192x128xf32>
    %48 = arith.addf %40, %47 : vector<192x128xf32>
    %c2_i32_40 = arith.constant 2 : i32
    %49 = arith.addi %32, %c2_i32_40 : i32
    %c0_41 = arith.constant 0 : index
    %50 = arith.index_cast %49 : i32 to index
    %c0_42 = arith.constant 0 : index
    %51 = vector.load %arg3[%c0_41, %50, %c0_42] : memref<1x456x4xf32, #tpu.memory_space<vmem>>, vector<1x192x4xf32>
    %52 = vector.shape_cast %51 : vector<1x192x4xf32> to vector<192x4xf32>
    %c1_43 = arith.constant 1 : index
    %c2_44 = arith.constant 2 : index
    %c0_45 = arith.constant 0 : index
    %c0_46 = arith.constant 0 : index
    %53 = vector.load %arg4[%c1_43, %c2_44, %c0_45, %c0_46] : memref<3x3x4x128xf32, #tpu.memory_space<vmem>>, vector<1x1x4x128xf32>
    %54 = vector.shape_cast %53 : vector<1x1x4x128xf32> to vector<4x128xf32>
    %cst_47 = arith.constant dense<0.000000e+00> : vector<192x128xf32>
    %55 = tpu.matmul %52, %54, %cst_47 {dimension_numbers = #tpu.dot_dimension_numbers<[1], [0], [0], [1], [0, 0, 1, 1], [], []>} : vector<192x4xf32>, vector<4x128xf32>, vector<192x128xf32> -> vector<192x128xf32>
    %56 = arith.addf %48, %55 : vector<192x128xf32>
    %c48_i32 = arith.constant 48 : i32
    %57 = arith.addi %5, %c48_i32 : i32
    %58 = tpu.assume_multiple %57, 8 : i32
    %c0_i32_48 = arith.constant 0 : i32
    %59 = arith.addi %58, %c0_i32_48 : i32
    %c0_49 = arith.constant 0 : index
    %60 = arith.index_cast %59 : i32 to index
    %c0_50 = arith.constant 0 : index
    %61 = vector.load %arg3[%c0_49, %60, %c0_50] : memref<1x456x4xf32, #tpu.memory_space<vmem>>, vector<1x192x4xf32>
    %62 = vector.shape_cast %61 : vector<1x192x4xf32> to vector<192x4xf32>
    %c2_51 = arith.constant 2 : index
    %c0_52 = arith.constant 0 : index
    %c0_53 = arith.constant 0 : index
    %c0_54 = arith.constant 0 : index
    %63 = vector.load %arg4[%c2_51, %c0_52, %c0_53, %c0_54] : memref<3x3x4x128xf32, #tpu.memory_space<vmem>>, vector<1x1x4x128xf32>
    %64 = vector.shape_cast %63 : vector<1x1x4x128xf32> to vector<4x128xf32>
    %cst_55 = arith.constant dense<0.000000e+00> : vector<192x128xf32>
    %65 = tpu.matmul %62, %64, %cst_55 {dimension_numbers = #tpu.dot_dimension_numbers<[1], [0], [0], [1], [0, 0, 1, 1], [], []>} : vector<192x4xf32>, vector<4x128xf32>, vector<192x128xf32> -> vector<192x128xf32>
    %66 = arith.addf %56, %65 : vector<192x128xf32>
    %c1_i32_56 = arith.constant 1 : i32
    %67 = arith.addi %58, %c1_i32_56 : i32
    %c0_57 = arith.constant 0 : index
    %68 = arith.index_cast %67 : i32 to index
    %c0_58 = arith.constant 0 : index
    %69 = vector.load %arg3[%c0_57, %68, %c0_58] : memref<1x456x4xf32, #tpu.memory_space<vmem>>, vector<1x192x4xf32>
    %70 = vector.shape_cast %69 : vector<1x192x4xf32> to vector<192x4xf32>
    %c2_59 = arith.constant 2 : index
    %c1_60 = arith.constant 1 : index
    %c0_61 = arith.constant 0 : index
    %c0_62 = arith.constant 0 : index
    %71 = vector.load %arg4[%c2_59, %c1_60, %c0_61, %c0_62] : memref<3x3x4x128xf32, #tpu.memory_space<vmem>>, vector<1x1x4x128xf32>
    %72 = vector.shape_cast %71 : vector<1x1x4x128xf32> to vector<4x128xf32>
    %cst_63 = arith.constant dense<0.000000e+00> : vector<192x128xf32>
    %73 = tpu.matmul %70, %72, %cst_63 {dimension_numbers = #tpu.dot_dimension_numbers<[1], [0], [0], [1], [0, 0, 1, 1], [], []>} : vector<192x4xf32>, vector<4x128xf32>, vector<192x128xf32> -> vector<192x128xf32>
    %74 = arith.addf %66, %73 : vector<192x128xf32>
    %c2_i32_64 = arith.constant 2 : i32
    %75 = arith.addi %58, %c2_i32_64 : i32
    %c0_65 = arith.constant 0 : index
    %76 = arith.index_cast %75 : i32 to index
    %c0_66 = arith.constant 0 : index
    %77 = vector.load %arg3[%c0_65, %76, %c0_66] : memref<1x456x4xf32, #tpu.memory_space<vmem>>, vector<1x192x4xf32>
    %78 = vector.shape_cast %77 : vector<1x192x4xf32> to vector<192x4xf32>
    %c2_67 = arith.constant 2 : index
    %c2_68 = arith.constant 2 : index
    %c0_69 = arith.constant 0 : index
    %c0_70 = arith.constant 0 : index
    %79 = vector.load %arg4[%c2_67, %c2_68, %c0_69, %c0_70] : memref<3x3x4x128xf32, #tpu.memory_space<vmem>>, vector<1x1x4x128xf32>
    %80 = vector.shape_cast %79 : vector<1x1x4x128xf32> to vector<4x128xf32>
    %cst_71 = arith.constant dense<0.000000e+00> : vector<192x128xf32>
    %81 = tpu.matmul %78, %80, %cst_71 {dimension_numbers = #tpu.dot_dimension_numbers<[1], [0], [0], [1], [0, 0, 1, 1], [], []>} : vector<192x4xf32>, vector<4x128xf32>, vector<192x128xf32> -> vector<192x128xf32>
    %82 = arith.addf %74, %81 : vector<192x128xf32>
    %83 = vector.broadcast %1 : vector<1x128xf32> to vector<192x128xf32>
    %84 = arith.mulf %82, %83 : vector<192x128xf32>
    %85 = vector.broadcast %2 : vector<1x128xf32> to vector<192x128xf32>
    %86 = arith.addf %84, %85 : vector<192x128xf32>
    %cst_72 = arith.constant 0.000000e+00 : f32
    %87 = vector.broadcast %cst_72 : f32 to vector<192x128xf32>
    %88 = arith.maximumf %86, %87 : vector<192x128xf32>
    %c0_73 = arith.constant 0 : index
    %c0_74 = arith.constant 0 : index
    %c0_75 = arith.constant 0 : index
    %89 = vector.load %arg7[%c0_73, %c0_74, %c0_75] : memref<1x384x128xf32, #tpu.memory_space<vmem>>, vector<1x192x128xf32>
    %90 = vector.shape_cast %89 : vector<1x192x128xf32> to vector<192x128xf32>
    %91 = vector.shape_cast %88 : vector<192x128xf32> to vector<1x192x128xf32>
    tpu.vector_store %arg7[%c0_73, %c0_74, %c0_75], %91 {strides = array<i32>} : memref<1x384x128xf32, #tpu.memory_space<vmem>>, vector<1x192x128xf32>,
    %c8_i32 = arith.constant 8 : i32
    %92 = arith.addi %0, %c8_i32 : i32
    %c24_i32_76 = arith.constant 24 : i32
    %93 = arith.muli %92, %c24_i32_76 : i32
    %94 = tpu.assume_multiple %93, 8 : i32
    %c0_i32_77 = arith.constant 0 : i32
    %95 = arith.addi %94, %c0_i32_77 : i32
    %96 = tpu.assume_multiple %95, 8 : i32
    %c0_i32_78 = arith.constant 0 : i32
    %97 = arith.addi %96, %c0_i32_78 : i32
    %c0_79 = arith.constant 0 : index
    %98 = arith.index_cast %97 : i32 to index
    %c0_80 = arith.constant 0 : index
    %99 = vector.load %arg3[%c0_79, %98, %c0_80] : memref<1x456x4xf32, #tpu.memory_space<vmem>>, vector<1x192x4xf32>
    %100 = vector.shape_cast %99 : vector<1x192x4xf32> to vector<192x4xf32>
    %c0_81 = arith.constant 0 : index
    %c0_82 = arith.constant 0 : index
    %c0_83 = arith.constant 0 : index
    %c0_84 = arith.constant 0 : index
    %101 = vector.load %arg4[%c0_81, %c0_82, %c0_83, %c0_84] : memref<3x3x4x128xf32, #tpu.memory_space<vmem>>, vector<1x1x4x128xf32>
    %102 = vector.shape_cast %101 : vector<1x1x4x128xf32> to vector<4x128xf32>
    %cst_85 = arith.constant dense<0.000000e+00> : vector<192x128xf32>
    %103 = tpu.matmul %100, %102, %cst_85 {dimension_numbers = #tpu.dot_dimension_numbers<[1], [0], [0], [1], [0, 0, 1, 1], [], []>} : vector<192x4xf32>, vector<4x128xf32>, vector<192x128xf32> -> vector<192x128xf32>
    %c1_i32_86 = arith.constant 1 : i32
    %104 = arith.addi %96, %c1_i32_86 : i32
    %c0_87 = arith.constant 0 : index
    %105 = arith.index_cast %104 : i32 to index
    %c0_88 = arith.constant 0 : index
    %106 = vector.load %arg3[%c0_87, %105, %c0_88] : memref<1x456x4xf32, #tpu.memory_space<vmem>>, vector<1x192x4xf32>
    %107 = vector.shape_cast %106 : vector<1x192x4xf32> to vector<192x4xf32>
    %c0_89 = arith.constant 0 : index
    %c1_90 = arith.constant 1 : index
    %c0_91 = arith.constant 0 : index
    %c0_92 = arith.constant 0 : index
    %108 = vector.load %arg4[%c0_89, %c1_90, %c0_91, %c0_92] : memref<3x3x4x128xf32, #tpu.memory_space<vmem>>, vector<1x1x4x128xf32>
    %109 = vector.shape_cast %108 : vector<1x1x4x128xf32> to vector<4x128xf32>
    %cst_93 = arith.constant dense<0.000000e+00> : vector<192x128xf32>
    %110 = tpu.matmul %107, %109, %cst_93 {dimension_numbers = #tpu.dot_dimension_numbers<[1], [0], [0], [1], [0, 0, 1, 1], [], []>} : vector<192x4xf32>, vector<4x128xf32>, vector<192x128xf32> -> vector<192x128xf32>
    %111 = arith.addf %103, %110 : vector<192x128xf32>
    %c2_i32_94 = arith.constant 2 : i32
    %112 = arith.addi %96, %c2_i32_94 : i32
    %c0_95 = arith.constant 0 : index
    %113 = arith.index_cast %112 : i32 to index
    %c0_96 = arith.constant 0 : index
    %114 = vector.load %arg3[%c0_95, %113, %c0_96] : memref<1x456x4xf32, #tpu.memory_space<vmem>>, vector<1x192x4xf32>
    %115 = vector.shape_cast %114 : vector<1x192x4xf32> to vector<192x4xf32>
    %c0_97 = arith.constant 0 : index
    %c2_98 = arith.constant 2 : index
    %c0_99 = arith.constant 0 : index
    %c0_100 = arith.constant 0 : index
    %116 = vector.load %arg4[%c0_97, %c2_98, %c0_99, %c0_100] : memref<3x3x4x128xf32, #tpu.memory_space<vmem>>, vector<1x1x4x128xf32>
    %117 = vector.shape_cast %116 : vector<1x1x4x128xf32> to vector<4x128xf32>
    %cst_101 = arith.constant dense<0.000000e+00> : vector<192x128xf32>
    %118 = tpu.matmul %115, %117, %cst_101 {dimension_numbers = #tpu.dot_dimension_numbers<[1], [0], [0], [1], [0, 0, 1, 1], [], []>} : vector<192x4xf32>, vector<4x128xf32>, vector<192x128xf32> -> vector<192x128xf32>
    %119 = arith.addf %111, %118 : vector<192x128xf32>
    %c24_i32_102 = arith.constant 24 : i32
    %120 = arith.addi %94, %c24_i32_102 : i32
    %121 = tpu.assume_multiple %120, 8 : i32
    %c0_i32_103 = arith.constant 0 : i32
    %122 = arith.addi %121, %c0_i32_103 : i32
    %c0_104 = arith.constant 0 : index
    %123 = arith.index_cast %122 : i32 to index
    %c0_105 = arith.constant 0 : index
    %124 = vector.load %arg3[%c0_104, %123, %c0_105] : memref<1x456x4xf32, #tpu.memory_space<vmem>>, vector<1x192x4xf32>
    %125 = vector.shape_cast %124 : vector<1x192x4xf32> to vector<192x4xf32>
    %c1_106 = arith.constant 1 : index
    %c0_107 = arith.constant 0 : index
    %c0_108 = arith.constant 0 : index
    %c0_109 = arith.constant 0 : index
    %126 = vector.load %arg4[%c1_106, %c0_107, %c0_108, %c0_109] : memref<3x3x4x128xf32, #tpu.memory_space<vmem>>, vector<1x1x4x128xf32>
    %127 = vector.shape_cast %126 : vector<1x1x4x128xf32> to vector<4x128xf32>
    %cst_110 = arith.constant dense<0.000000e+00> : vector<192x128xf32>
    %128 = tpu.matmul %125, %127, %cst_110 {dimension_numbers = #tpu.dot_dimension_numbers<[1], [0], [0], [1], [0, 0, 1, 1], [], []>} : vector<192x4xf32>, vector<4x128xf32>, vector<192x128xf32> -> vector<192x128xf32>
    %129 = arith.addf %119, %128 : vector<192x128xf32>
    %c1_i32_111 = arith.constant 1 : i32
    %130 = arith.addi %121, %c1_i32_111 : i32
    %c0_112 = arith.constant 0 : index
    %131 = arith.index_cast %130 : i32 to index
    %c0_113 = arith.constant 0 : index
    %132 = vector.load %arg3[%c0_112, %131, %c0_113] : memref<1x456x4xf32, #tpu.memory_space<vmem>>, vector<1x192x4xf32>
    %133 = vector.shape_cast %132 : vector<1x192x4xf32> to vector<192x4xf32>
    %c1_114 = arith.constant 1 : index
    %c1_115 = arith.constant 1 : index
    %c0_116 = arith.constant 0 : index
    %c0_117 = arith.constant 0 : index
    %134 = vector.load %arg4[%c1_114, %c1_115, %c0_116, %c0_117] : memref<3x3x4x128xf32, #tpu.memory_space<vmem>>, vector<1x1x4x128xf32>
    %135 = vector.shape_cast %134 : vector<1x1x4x128xf32> to vector<4x128xf32>
    %cst_118 = arith.constant dense<0.000000e+00> : vector<192x128xf32>
    %136 = tpu.matmul %133, %135, %cst_118 {dimension_numbers = #tpu.dot_dimension_numbers<[1], [0], [0], [1], [0, 0, 1, 1], [], []>} : vector<192x4xf32>, vector<4x128xf32>, vector<192x128xf32> -> vector<192x128xf32>
    %137 = arith.addf %129, %136 : vector<192x128xf32>
    %c2_i32_119 = arith.constant 2 : i32
    %138 = arith.addi %121, %c2_i32_119 : i32
    %c0_120 = arith.constant 0 : index
    %139 = arith.index_cast %138 : i32 to index
    %c0_121 = arith.constant 0 : index
    %140 = vector.load %arg3[%c0_120, %139, %c0_121] : memref<1x456x4xf32, #tpu.memory_space<vmem>>, vector<1x192x4xf32>
    %141 = vector.shape_cast %140 : vector<1x192x4xf32> to vector<192x4xf32>
    %c1_122 = arith.constant 1 : index
    %c2_123 = arith.constant 2 : index
    %c0_124 = arith.constant 0 : index
    %c0_125 = arith.constant 0 : index
    %142 = vector.load %arg4[%c1_122, %c2_123, %c0_124, %c0_125] : memref<3x3x4x128xf32, #tpu.memory_space<vmem>>, vector<1x1x4x128xf32>
    %143 = vector.shape_cast %142 : vector<1x1x4x128xf32> to vector<4x128xf32>
    %cst_126 = arith.constant dense<0.000000e+00> : vector<192x128xf32>
    %144 = tpu.matmul %141, %143, %cst_126 {dimension_numbers = #tpu.dot_dimension_numbers<[1], [0], [0], [1], [0, 0, 1, 1], [], []>} : vector<192x4xf32>, vector<4x128xf32>, vector<192x128xf32> -> vector<192x128xf32>
    %145 = arith.addf %137, %144 : vector<192x128xf32>
    %c48_i32_127 = arith.constant 48 : i32
    %146 = arith.addi %94, %c48_i32_127 : i32
    %147 = tpu.assume_multiple %146, 8 : i32
    %c0_i32_128 = arith.constant 0 : i32
    %148 = arith.addi %147, %c0_i32_128 : i32
    %c0_129 = arith.constant 0 : index
    %149 = arith.index_cast %148 : i32 to index
    %c0_130 = arith.constant 0 : index
    %150 = vector.load %arg3[%c0_129, %149, %c0_130] : memref<1x456x4xf32, #tpu.memory_space<vmem>>, vector<1x192x4xf32>
    %151 = vector.shape_cast %150 : vector<1x192x4xf32> to vector<192x4xf32>
    %c2_131 = arith.constant 2 : index
    %c0_132 = arith.constant 0 : index
    %c0_133 = arith.constant 0 : index
    %c0_134 = arith.constant 0 : index
    %152 = vector.load %arg4[%c2_131, %c0_132, %c0_133, %c0_134] : memref<3x3x4x128xf32, #tpu.memory_space<vmem>>, vector<1x1x4x128xf32>
    %153 = vector.shape_cast %152 : vector<1x1x4x128xf32> to vector<4x128xf32>
    %cst_135 = arith.constant dense<0.000000e+00> : vector<192x128xf32>
    %154 = tpu.matmul %151, %153, %cst_135 {dimension_numbers = #tpu.dot_dimension_numbers<[1], [0], [0], [1], [0, 0, 1, 1], [], []>} : vector<192x4xf32>, vector<4x128xf32>, vector<192x128xf32> -> vector<192x128xf32>
    %155 = arith.addf %145, %154 : vector<192x128xf32>
    %c1_i32_136 = arith.constant 1 : i32
    %156 = arith.addi %147, %c1_i32_136 : i32
    %c0_137 = arith.constant 0 : index
    %157 = arith.index_cast %156 : i32 to index
    %c0_138 = arith.constant 0 : index
    %158 = vector.load %arg3[%c0_137, %157, %c0_138] : memref<1x456x4xf32, #tpu.memory_space<vmem>>, vector<1x192x4xf32>
    %159 = vector.shape_cast %158 : vector<1x192x4xf32> to vector<192x4xf32>
    %c2_139 = arith.constant 2 : index
    %c1_140 = arith.constant 1 : index
    %c0_141 = arith.constant 0 : index
    %c0_142 = arith.constant 0 : index
    %160 = vector.load %arg4[%c2_139, %c1_140, %c0_141, %c0_142] : memref<3x3x4x128xf32, #tpu.memory_space<vmem>>, vector<1x1x4x128xf32>
    %161 = vector.shape_cast %160 : vector<1x1x4x128xf32> to vector<4x128xf32>
    %cst_143 = arith.constant dense<0.000000e+00> : vector<192x128xf32>
    %162 = tpu.matmul %159, %161, %cst_143 {dimension_numbers = #tpu.dot_dimension_numbers<[1], [0], [0], [1], [0, 0, 1, 1], [], []>} : vector<192x4xf32>, vector<4x128xf32>, vector<192x128xf32> -> vector<192x128xf32>
    %163 = arith.addf %155, %162 : vector<192x128xf32>
    %c2_i32_144 = arith.constant 2 : i32
    %164 = arith.addi %147, %c2_i32_144 : i32
    %c0_145 = arith.constant 0 : index
    %165 = arith.index_cast %164 : i32 to index
    %c0_146 = arith.constant 0 : index
    %166 = vector.load %arg3[%c0_145, %165, %c0_146] : memref<1x456x4xf32, #tpu.memory_space<vmem>>, vector<1x192x4xf32>
    %167 = vector.shape_cast %166 : vector<1x192x4xf32> to vector<192x4xf32>
    %c2_147 = arith.constant 2 : index
    %c2_148 = arith.constant 2 : index
    %c0_149 = arith.constant 0 : index
    %c0_150 = arith.constant 0 : index
    %168 = vector.load %arg4[%c2_147, %c2_148, %c0_149, %c0_150] : memref<3x3x4x128xf32, #tpu.memory_space<vmem>>, vector<1x1x4x128xf32>
    %169 = vector.shape_cast %168 : vector<1x1x4x128xf32> to vector<4x128xf32>
    %cst_151 = arith.constant dense<0.000000e+00> : vector<192x128xf32>
    %170 = tpu.matmul %167, %169, %cst_151 {dimension_numbers = #tpu.dot_dimension_numbers<[1], [0], [0], [1], [0, 0, 1, 1], [], []>} : vector<192x4xf32>, vector<4x128xf32>, vector<192x128xf32> -> vector<192x128xf32>
    %171 = arith.addf %163, %170 : vector<192x128xf32>
    %172 = vector.broadcast %1 : vector<1x128xf32> to vector<192x128xf32>
    %173 = arith.mulf %171, %172 : vector<192x128xf32>
    %174 = vector.broadcast %2 : vector<1x128xf32> to vector<192x128xf32>
    %175 = arith.addf %173, %174 : vector<192x128xf32>
    %cst_152 = arith.constant 0.000000e+00 : f32
    %176 = vector.broadcast %cst_152 : f32 to vector<192x128xf32>
    %177 = arith.maximumf %175, %176 : vector<192x128xf32>
    %c0_153 = arith.constant 0 : index
    %c192 = arith.constant 192 : index
    %c0_154 = arith.constant 0 : index
    %178 = vector.load %arg7[%c0_153, %c192, %c0_154] : memref<1x384x128xf32, #tpu.memory_space<vmem>>, vector<1x192x128xf32>
    %179 = vector.shape_cast %178 : vector<1x192x128xf32> to vector<192x128xf32>
    %180 = vector.shape_cast %177 : vector<192x128xf32> to vector<1x192x128xf32>
    tpu.vector_store %arg7[%c0_153, %c192, %c0_154], %180 {strides = array<i32>} : memref<1x384x128xf32, #tpu.memory_space<vmem>>, vector<1x192x128xf32>,
    return
  }
  func.func @transform_0(%arg0: i32, %arg1: i32, %arg2: i32) -> (i32, i32, i32) {
    %c0_i32 = arith.constant 0 : i32
    %c0_i32_0 = arith.constant 0 : i32
    %c0_i32_1 = arith.constant 0 : i32
    return %arg0, %c0_i32, %c0_i32_0 : i32, i32, i32
  }
  func.func @transform_1(%arg0: i32, %arg1: i32, %arg2: i32) -> (i32, i32, i32, i32) {
    %c0_i32 = arith.constant 0 : i32
    %c0_i32_0 = arith.constant 0 : i32
    %c0_i32_1 = arith.constant 0 : i32
    %c0_i32_2 = arith.constant 0 : i32
    return %c0_i32, %c0_i32_0, %c0_i32_1, %arg1 : i32, i32, i32, i32
  }
  func.func @transform_2(%arg0: i32, %arg1: i32, %arg2: i32) -> (i32, i32) {
    %c0_i32 = arith.constant 0 : i32
    %c0_i32_0 = arith.constant 0 : i32
    return %c0_i32, %arg1 : i32, i32
  }
  func.func @transform_3(%arg0: i32, %arg1: i32, %arg2: i32) -> (i32, i32) {
    %c0_i32 = arith.constant 0 : i32
    %c0_i32_0 = arith.constant 0 : i32
    return %c0_i32, %arg1 : i32, i32
  }
  func.func @transform_4(%arg0: i32, %arg1: i32, %arg2: i32) -> (i32, i32, i32) {
    %c0_i32 = arith.constant 0 : i32
    return %arg0, %arg2, %arg1 : i32, i32, i32
  }
}

</mosaic_0001>

<bundles_post_ra>
// kernel: tpu_custom_call.1
= control target key start
LH: loop header
LB: loop body
LE: loop exit
PB: predicated region body
PF: predicated region fallthrough
CT: control target
= control target key end

     0   :  { %9 = vsyncpa [#allocation3], 0  ;;  %s10450_s0 = inlined_call_operand.vmem [shape: f32[2,456,4], index: 0, kind: input, shape index: {}]   ;;  %s10451_s1 = inlined_call_operand.vmem [shape: f32[3,3,4,128], index: 1, kind: input, shape index: {}]   ;;  %s10452_s2 = inlined_call_operand.vmem [shape: f32[1,128], index: 2, kind: input, shape index: {}]   ;;  %s10453_s3 = inlined_call_operand.vmem [shape: f32[1,128], index: 3, kind: input, shape index: {}]   ;;  %s10454_s4 = inlined_call_operand.hbm [shape: f32[2,384,128], index: 4, kind: output, shape index: {}]  }
   0x1   :  { %11 = vsyncpa [#allocation3 + $0x1], 0  ;;  %s8754_s15 = smov 0   ;;  %s8756_s16 = smov 0  }
   0x2   :  { %s8758_s17 = smov 0   ;;  %s8760_s18 = smov 0  }
   0x3   :  { %s8762_s19 = smov 0   ;;  %s8764_s20 = smov 0  }
   0x4 LB: > { %s6180_s21 = sadd.s32 4294967295, %s8724_s20   ;;  %s6181_s22 = sadd.s32 4294967294, %s8724_s20   ;;  %s8724_s20 = sphi %s8764_s20, %s17_s20   ;;  %s8720_s19 = sphi %s8762_s19, %s10686_s19   ;;  %s8716_s18 = sphi %s8760_s18, %s10685_s18   ;;  %s8712_s17 = sphi %s8758_s17, %s10684_s17   ;;  %s8708_s16 = sphi %s8756_s16, %s10683_s16   ;;  %s8704_s15 = sphi %s8754_s15, %s10682_s15  }
   0x5   : > { %s36_s23 = sadd.s32 1, %s8720_s19  ;;  %s151_s24 = sadd.s32 1, %s8712_s17 }
   0x6   : > { %p38_p0 = scmp.ge.s32.totalorder %s36_s23, 2  ;;  %p161_p1 = scmp.ne.s32.totalorder %s8712_s17, %s8708_s16 }
   0x7   : > { %p162_p2 = scmp.eq.s32.totalorder %s6180_s21, 1  ;;  %p167_p3 = scmp.ne.s32.totalorder %s8708_s16, %s8704_s15 }
   0x8   : > { %s10688_s23 = smov (%p38_p0, %s36_s23), 0  ;;  %p168_p5 = scmp.eq.s32.totalorder %s6181_s22, 1 }
   0x9   : > { %p8794_p4 = por %p162_p2, %p161_p1  ;;  %s144_s26 = ssub.s32 %s8720_s19, %s10688_s23 }
   0xa   : > { %p6187_p6 = scmp.ge.s32.totalorder %s8724_s20, 1  ;;  %p149_p7 = scmp.eq.s32.totalorder %s144_s26, 0 }
   0xb   : > { %p8801_p8 = por %p168_p5, %p167_p3  ;;  %p213_p9 = scmp.lt.s32.totalorder %s8724_s20, 3 }
   0xc   : > { %s8807_s28 = scalar_select %p149_p7, %s8712_s17, %s151_s24  }
   0xd   : > { %p214_p10 = pnand %p6187_p6, %p213_p9 }
   0xf   : > { %217 = sbr.rel (%p214_p10) target bundleno = 694 (0x2b6), region = 36 }
  0x16   : > { %v6213_v0 = vld [vmem:[%s10451_s1 + $0x4] sm:$0xf]  ;;  %vm396_vm0 = vcmask 1043456   ;;  %p249_p11 = scmp.lt.s32.totalorder %s8716_s18, 1  ;;  %v294_v2 = vld [vmem:[%s10451_s1] sm:$0xf] }
  0x17   : > { %v6664_v1 = vld [vmem:[%s10451_s1 + $0x4] sm:$0xf]  ;;  %7518 = vmatprep.subr.msk.mxu0 %vm396_vm0, %v6213_v0  ;;  %v3164_v3 = vld [vmem:[%s10451_s1] sm:$0xf]  ;;  %vm323_vm1 = vcmask 31744   ;;  %s246_s13 = sand.u32 1, %s8708_s16  }
  0x18   : > { %7860 = vmatprep.subr.msk.mxu1 %vm396_vm0, %v6664_v1  ;;  %7519 = vmatpush3.msk.msra.mxu0 %vm396_vm0, %v6213_v0  ;;  %s250_s11 = scalar_select %p249_p11, %s8716_s18, 1  ;;  %v8855_v10 = vld [vmem:[%s10451_s1 + $0x8] sm:$0xf]  ;;  %v9102_v60 = vld [vmem:[%s10451_s1 + $0xc] sm:$0xf] }
  0x19   : > { %7861 = vmatpush3.msk.msra.mxu1 %vm396_vm0, %v6664_v1  ;;  %7556 = vmatprep.subr.msk.mxu0 %vm396_vm0, %v294_v2  ;;  %v8860_v11 = vld [vmem:[%s10451_s1 + $0x8] sm:$0xf]  ;;  %v9107_v61 = vld [vmem:[%s10451_s1 + $0xc] sm:$0xf]  ;;  %s8586_s24 = smul.u32 384, %s246_s13  ;;  %s10404_s8 = scalar_lea.sflag [#allocation3], %s246_s13 }
  0x1a   : > { %7898 = vmatprep.subr.msk.mxu1 %vm396_vm0, %v3164_v3  ;;  %s8587_s12 = smul.u32 456, %s250_s11  ;;  %s8726_s10 = smov [#allocation2]  }
  0x1b   : > { %s8588_s30 = smul.u32 6144, %s8716_s18  ;;  %s8650_s11 = sshll.u32 %s8726_s10, 4  ;;  %s8651_s11 = int_to_ptr.vmem [resolvable:$false] %s8650_s11 }
  0x1c   : > { %s8832_s21 = scalar_lea.vmem %s10450_s0, %s8587_s12  ;;  %s8652_s12 = scalar_lea.vmem %s8651_s11, 12288 }
  0x1d   : > { %v6189_v4 = vld [vmem:[%s8832_s21 + $0x1] sm:$0xff]  ;;  %v6190_v6 = vld [vmem:[%s8832_s21 + $0x9] sm:$0xff]  ;;  %v6191_v8 = vld [vmem:[%s8832_s21 + $0x11] sm:$0xff]  ;;  %s10394_s7 = scalar_lea.hbm %s10454_s4, %s8588_s30 }
  0x1e   : > { %v8836_v5 = vld [vmem:[%s8832_s21 + $0xc1] sm:$0xff]  ;;  %7520 = vmatprep.mubr.msk.f32.mxu0 %vm323_vm1, %v6189_v4  ;;  %v8843_v7 = vld [vmem:[%s8832_s21 + $0xc9] sm:$0xff]  ;;  %v8847_v9 = vld [vmem:[%s8832_s21 + $0xd1] sm:$0xff] }
  0x1f   : > { %10532 = vst [vmem:[#allocation5_spill] sm:$0xff] %v8836_v5  ;;  %7862 = vmatprep.mubr.msk.f32.mxu1 %vm323_vm1, %v8836_v5  ;;  %10533 = vst [vmem:[#allocation6_spill] sm:$0xff] %v8843_v7  ;;  %7521 = vmatmul.mubr.msk.f32.vlgmr.msra.gmra.mrb[0].mxu0 %vm323_vm1, %v6190_v6  ;;  %v8865_v12 = vld [vmem:[%s8832_s21 + $0x19] sm:$0xff]  ;;  %v8874_v14 = vld [vmem:[%s8832_s21 + $0x21] sm:$0xff] }
  0x20   : > { %10534 = vst [vmem:[#allocation7_spill] sm:$0xff] %v8847_v9  ;;  %7863 = vmatmul.mubr.msk.f32.vlgmr.msra.gmra.mrb[0].mxu1 %vm323_vm1, %v8843_v7  ;;  %7557 = vmatpush3.msk.msra.mxu0 %vm396_vm0, %v294_v2  ;;  %v8868_v13 = vld [vmem:[%s8832_s21 + $0xd9] sm:$0xff]  ;;  %v8877_v15 = vld [vmem:[%s8832_s21 + $0xe1] sm:$0xff]  ;;  %v8892_v16 = vld [vmem:[%s8832_s21 + $0x29] sm:$0xff] }
  0x21   : > { %7899 = vmatpush3.msk.msra.mxu1 %vm396_vm0, %v3164_v3  ;;  %7523 = vmatprep.mubr.msk.f32.mxu0 %vm323_vm1, %v6191_v8  ;;  %v8895_v17 = vld [vmem:[%s8832_s21 + $0xe9] sm:$0xff]  ;;  %v8898_v18 = vld [vmem:[%s8832_s21 + $0x31] sm:$0xff]  ;;  %v8912_v20 = vld [vmem:[%s8832_s21 + $0x39] sm:$0xff] }
  0x22   : > { %7865 = vmatprep.mubr.msk.f32.mxu1 %vm323_vm1, %v8847_v9  ;;  %7594 = vmatprep.subr.msk.mxu0 %vm396_vm0, %v8855_v10  ;;  %v8901_v19 = vld [vmem:[%s8832_s21 + $0xf1] sm:$0xff]  ;;  %v8915_v21 = vld [vmem:[%s8832_s21 + $0xf9] sm:$0xff]  ;;  %v8918_v22 = vld [vmem:[%s8832_s21 + $0x41] sm:$0xff] }
  0x23   : > { %7936 = vmatprep.subr.msk.mxu1 %vm396_vm0, %v8860_v11  ;;  %7524 = vmatmul.mubr.msk.f32.gmra.mrb[2].mxu0 %vm323_vm1, %v8865_v12  ;;  %10535 = vst [vmem:[#allocation8_spill] sm:$0xff] %v8915_v21  ;;  %10536 = vst [vmem:[#allocation9_spill] sm:$0xff] %v8918_v22  ;;  %v8921_v23 = vld [vmem:[%s8832_s21 + $0x101] sm:$0xff]  ;;  %v8932_v24 = vld [vmem:[%s8832_s21 + $0x49] sm:$0xff] }
  0x24   : > { %7866 = vmatmul.mubr.msk.f32.gmra.mrb[2].mxu1 %vm323_vm1, %v8868_v13  ;;  %7526 = vmatprep.mubr.msk.f32.mxu0 %vm323_vm1, %v8874_v14  ;;  %10537 = vst [vmem:[#allocation10_spill] sm:$0xff] %v8921_v23  ;;  %10538 = vst [vmem:[#allocation11_spill] sm:$0xff] %v8932_v24  ;;  %v8935_v25 = vld [vmem:[%s8832_s21 + $0x109] sm:$0xff]  ;;  %v8938_v26 = vld [vmem:[%s8832_s21 + $0x51] sm:$0xff] }
  0x25   : > { %7868 = vmatprep.mubr.msk.f32.mxu1 %vm323_vm1, %v8877_v15  ;;  %10539 = vst [vmem:[#allocation12_spill] sm:$0xff] %v8935_v25  ;;  %10540 = vst [vmem:[#allocation13_spill] sm:$0xff] %v8938_v26  ;;  %v8941_v27 = vld [vmem:[%s8832_s21 + $0x111] sm:$0xff]  ;;  %v8952_v28 = vld [vmem:[%s8832_s21 + $0x59] sm:$0xff] }
  0x26   : > { %10541 = vst [vmem:[#allocation14_spill] sm:$0xff] %v8941_v27  ;;  %10542 = vst [vmem:[#allocation15_spill] sm:$0xff] %v8952_v28  ;;  %v8955_v29 = vld [vmem:[%s8832_s21 + $0x119] sm:$0xff]  ;;  %v8958_v30 = vld [vmem:[%s8832_s21 + $0x61] sm:$0xff] }
  0x27   : > { %7527 = vmatmul.mubr.msk.f32.gmra.mrb[4].mxu0 %vm323_vm1, %v8892_v16  ;;  %10543 = vst [vmem:[#allocation16_spill] sm:$0xff] %v8955_v29  ;;  %10544 = vst [vmem:[#allocation17_spill] sm:$0xff] %v8958_v30  ;;  %v8961_v31 = vld [vmem:[%s8832_s21 + $0x121] sm:$0xff]  ;;  %v8972_v32 = vld [vmem:[%s8832_s21 + $0x69] sm:$0xff] }
  0x28   : > { %7869 = vmatmul.mubr.msk.f32.gmra.mrb[4].mxu1 %vm323_vm1, %v8895_v17  ;;  %7529 = vmatprep.mubr.msk.f32.mxu0 %vm323_vm1, %v8898_v18  ;;  %10545 = vst [vmem:[#allocation18_spill] sm:$0xff] %v8961_v31  ;;  %10546 = vst [vmem:[#allocation19_spill] sm:$0xff] %v8972_v32  ;;  %v8975_v33 = vld [vmem:[%s8832_s21 + $0x129] sm:$0xff]  ;;  %v8978_v34 = vld [vmem:[%s8832_s21 + $0x71] sm:$0xff] }
  0x29   : > { %7871 = vmatprep.mubr.msk.f32.mxu1 %vm323_vm1, %v8901_v19  ;;  %10547 = vst [vmem:[#allocation20_spill] sm:$0xff] %v8975_v33  ;;  %10548 = vst [vmem:[#allocation21_spill] sm:$0xff] %v8978_v34  ;;  %v8981_v35 = vld [vmem:[%s8832_s21 + $0x131] sm:$0xff]  ;;  %v8992_v36 = vld [vmem:[%s8832_s21 + $0x79] sm:$0xff] }
  0x2a   : > { %10549 = vst [vmem:[#allocation22_spill] sm:$0xff] %v8981_v35  ;;  %10550 = vst [vmem:[#allocation23_spill] sm:$0xff] %v8992_v36  ;;  %v8995_v37 = vld [vmem:[%s8832_s21 + $0x139] sm:$0xff]  ;;  %v8998_v38 = vld [vmem:[%s8832_s21 + $0x81] sm:$0xff] }
  0x2b   : > { %7530 = vmatmul.mubr.msk.f32.gmra.mrb[6].mxu0 %vm323_vm1, %v8912_v20  ;;  %10551 = vst [vmem:[#allocation24_spill] sm:$0xff] %v8995_v37  ;;  %10552 = vst [vmem:[#allocation25_spill] sm:$0xff] %v8998_v38  ;;  %v9001_v39 = vld [vmem:[%s8832_s21 + $0x141] sm:$0xff]  ;;  %v9012_v40 = vld [vmem:[%s8832_s21 + $0x89] sm:$0xff] }
  0x2c   : > { %7872 = vmatmul.mubr.msk.f32.gmra.mrb[6].mxu1 %vm323_vm1, %v8915_v21  ;;  %7532 = vmatprep.mubr.msk.f32.mxu0 %vm323_vm1, %v8918_v22  ;;  %10553 = vst [vmem:[#allocation26_spill] sm:$0xff] %v9001_v39  ;;  %10554 = vst [vmem:[#allocation27_spill] sm:$0xff] %v9012_v40  ;;  %v9015_v41 = vld [vmem:[%s8832_s21 + $0x149] sm:$0xff]  ;;  %v9018_v42 = vld [vmem:[%s8832_s21 + $0x91] sm:$0xff] }
  0x2d   : > { %7874 = vmatprep.mubr.msk.f32.mxu1 %vm323_vm1, %v8921_v23  ;;  %10555 = vst [vmem:[#allocation28_spill] sm:$0xff] %v9015_v41  ;;  %10556 = vst [vmem:[#allocation29_spill] sm:$0xff] %v9018_v42  ;;  %v9021_v43 = vld [vmem:[%s8832_s21 + $0x151] sm:$0xff]  ;;  %v9032_v44 = vld [vmem:[%s8832_s21 + $0x99] sm:$0xff] }
  0x2e   : > { %10557 = vst [vmem:[#allocation30_spill] sm:$0xff] %v9021_v43  ;;  %10558 = vst [vmem:[#allocation31_spill] sm:$0xff] %v9032_v44  ;;  %v9035_v45 = vld [vmem:[%s8832_s21 + $0x159] sm:$0xff]  ;;  %v9038_v46 = vld [vmem:[%s8832_s21 + $0xa1] sm:$0xff] }
  0x2f   : > { %7533 = vmatmul.mubr.msk.f32.gmra.mrb[8].mxu0 %vm323_vm1, %v8932_v24  ;;  %10559 = vst [vmem:[#allocation32_spill] sm:$0xff] %v9035_v45  ;;  %10560 = vst [vmem:[#allocation33_spill] sm:$0xff] %v9038_v46  ;;  %v9041_v47 = vld [vmem:[%s8832_s21 + $0x161] sm:$0xff]  ;;  %v9052_v48 = vld [vmem:[%s8832_s21 + $0xa9] sm:$0xff] }
  0x30   : > { %7875 = vmatmul.mubr.msk.f32.gmra.mrb[8].mxu1 %vm323_vm1, %v8935_v25  ;;  %7535 = vmatprep.mubr.msk.f32.mxu0 %vm323_vm1, %v8938_v26  ;;  %10561 = vst [vmem:[#allocation34_spill] sm:$0xff] %v9041_v47  ;;  %10562 = vst [vmem:[#allocation35_spill] sm:$0xff] %v9052_v48  ;;  %v9055_v49 = vld [vmem:[%s8832_s21 + $0x169] sm:$0xff]  ;;  %v9058_v50 = vld [vmem:[%s8832_s21 + $0xb1] sm:$0xff] }
  0x31   : > { %7877 = vmatprep.mubr.msk.f32.mxu1 %vm323_vm1, %v8941_v27  ;;  %10563 = vst [vmem:[#allocation36_spill] sm:$0xff] %v9055_v49  ;;  %10564 = vst [vmem:[#allocation37_spill] sm:$0xff] %v9058_v50  ;;  %v9061_v51 = vld [vmem:[%s8832_s21 + $0x171] sm:$0xff]  ;;  %v9072_v52 = vld [vmem:[%s8832_s21 + $0xb9] sm:$0xff] }
  0x32   : > { %10565 = vst [vmem:[#allocation38_spill] sm:$0xff] %v9061_v51  ;;  %10566 = vst [vmem:[#allocation39_spill] sm:$0xff] %v9072_v52  ;;  %v9075_v53 = vld [vmem:[%s8832_s21 + $0x179] sm:$0xff]  ;;  %v271_v56 = vld [vmem:[%s8832_s21 + $0x8] sm:$0xff] }
  0x33   : > { %7536 = vmatmul.mubr.msk.f32.gmra.mrb[10].mxu0 %vm323_vm1, %v8952_v28  ;;  %10567 = vst [vmem:[#allocation40_spill] sm:$0xff] %v9075_v53  ;;  %v270_v54 = vld [vmem:[%s8832_s21] sm:$0xff]  ;;  %v9090_v57 = vld [vmem:[%s8832_s21 + $0xc8] sm:$0xff]  ;;  %v272_v58 = vld [vmem:[%s8832_s21 + $0x10] sm:$0xff] }
  0x34   : > { %7878 = vmatmul.mubr.msk.f32.gmra.mrb[10].mxu1 %vm323_vm1, %v8955_v29  ;;  %7538 = vmatprep.mubr.msk.f32.mxu0 %vm323_vm1, %v8958_v30  ;;  %v9079_v55 = vld [vmem:[%s8832_s21 + $0xc0] sm:$0xff]  ;;  %v9094_v59 = vld [vmem:[%s8832_s21 + $0xd0] sm:$0xff]  ;;  %v9114_v62 = vld [vmem:[%s8832_s21 + $0x18] sm:$0xff] }
  0x35   : > { %7880 = vmatprep.mubr.msk.f32.mxu1 %vm323_vm1, %v8961_v31  ;;  %v9117_v63 = vld [vmem:[%s8832_s21 + $0xd8] sm:$0xff]  ;;  %v9123_v0 = vld [vmem:[%s8832_s21 + $0x20] sm:$0xff]  ;;  %v9141_v2 = vld [vmem:[%s8832_s21 + $0x28] sm:$0xff] }
  0x36   : > { %v9126_v1 = vld [vmem:[%s8832_s21 + $0xe0] sm:$0xff]  ;;  %v9144_v3 = vld [vmem:[%s8832_s21 + $0xe8] sm:$0xff]  ;;  %v9147_v4 = vld [vmem:[%s8832_s21 + $0x30] sm:$0xff] }
  0x37   : > { %7539 = vmatmul.mubr.msk.f32.gmra.mrb[12].mxu0 %vm323_vm1, %v8972_v32  ;;  %v9150_v6 = vld [vmem:[%s8832_s21 + $0xf0] sm:$0xff]  ;;  %v9161_v8 = vld [vmem:[%s8832_s21 + $0x38] sm:$0xff]  ;;  %v6264_v28 = vld [vmem:[%s8832_s21 + $0x2] sm:$0xff] }
  0x38   : > { %7881 = vmatmul.mubr.msk.f32.gmra.mrb[12].mxu1 %vm323_vm1, %v8975_v33  ;;  %7541 = vmatprep.mubr.msk.f32.mxu0 %vm323_vm1, %v8978_v34  ;;  %v9187_v9 = vld [vmem:[%s8832_s21 + $0x50] sm:$0xff]  ;;  %v9201_v5 = vld [vmem:[%s8832_s21 + $0x58] sm:$0xff]  ;;  %v9301_v34 = vld [vmem:[%s8832_s21 + $0xa8] sm:$0xff] }
  0x39   : > { %7883 = vmatprep.mubr.msk.f32.mxu1 %vm323_vm1, %v8981_v35  ;;  %v9190_v7 = vld [vmem:[%s8832_s21 + $0x110] sm:$0xff]  ;;  %v9290_v35 = vld [vmem:[%s8832_s21 + $0x160] sm:$0xff]  ;;  %v9304_v33 = vld [vmem:[%s8832_s21 + $0x168] sm:$0xff] }
  0x3a   : > { %v9307_v32 = vld [vmem:[%s8832_s21 + $0xb0] sm:$0xff]  ;;  %v9321_v30 = vld [vmem:[%s8832_s21 + $0xb8] sm:$0xff]  ;;  %v9328_v27 = vld [vmem:[%s8832_s21 + $0xc2] sm:$0xff] }
  0x3b   : > { %7542 = vmatmul.mubr.msk.f32.gmra.mrb[14].mxu0 %vm323_vm1, %v8992_v36  ;;  %v9287_v36 = vld [vmem:[%s8832_s21 + $0xa0] sm:$0xff]  ;;  %v9310_v31 = vld [vmem:[%s8832_s21 + $0x170] sm:$0xff]  ;;  %v9324_v29 = vld [vmem:[%s8832_s21 + $0x178] sm:$0xff]  ;;  %10568 = vst [vmem:[#allocation41_spill] sm:$0xff] %v9328_v27 }
  0x3c   : > { %7884 = vmatmul.mubr.msk.f32.gmra.mrb[14].mxu1 %vm323_vm1, %v8995_v37  ;;  %7544 = vmatprep.mubr.msk.f32.mxu0 %vm323_vm1, %v8998_v38  ;;  %v9281_v38 = vld [vmem:[%s8832_s21 + $0x98] sm:$0xff]  ;;  %v6265_v26 = vld [vmem:[%s8832_s21 + $0xa] sm:$0xff]  ;;  %v9372_v22 = vld [vmem:[%s8832_s21 + $0x22] sm:$0xff] }
  0x3d   : > { %7886 = vmatprep.mubr.msk.f32.mxu1 %vm323_vm1, %v9001_v39  ;;  %v9270_v39 = vld [vmem:[%s8832_s21 + $0x150] sm:$0xff]  ;;  %v9284_v37 = vld [vmem:[%s8832_s21 + $0x158] sm:$0xff]  ;;  %10573 = vst [vmem:[#allocation46_spill] sm:$0xff] %v9372_v22  ;;  %v9375_v21 = vld [vmem:[%s8832_s21 + $0xe2] sm:$0xff] }
  0x3e   : > { %v9339_v25 = vld [vmem:[%s8832_s21 + $0xca] sm:$0xff]  ;;  %v6266_v24 = vld [vmem:[%s8832_s21 + $0x12] sm:$0xff]  ;;  %10574 = vst [vmem:[#allocation47_spill] sm:$0xff] %v9375_v21 }
  0x3f   : > { %7545 = vmatmul.mubr.msk.f32.gmra.mrb[16].mxu0 %vm323_vm1, %v9012_v40  ;;  %v9267_v40 = vld [vmem:[%s8832_s21 + $0x90] sm:$0xff]  ;;  %10569 = vst [vmem:[#allocation42_spill] sm:$0xff] %v9339_v25 }
  0x40   : > { %7887 = vmatmul.mubr.msk.f32.gmra.mrb[16].mxu1 %vm323_vm1, %v9015_v41  ;;  %7547 = vmatprep.mubr.msk.f32.mxu0 %vm323_vm1, %v9018_v42  ;;  %v9261_v42 = vld [vmem:[%s8832_s21 + $0x88] sm:$0xff]  ;;  %v9343_v23 = vld [vmem:[%s8832_s21 + $0xd2] sm:$0xff] }
  0x41   : > { %7889 = vmatprep.mubr.msk.f32.mxu1 %vm323_vm1, %v9021_v43  ;;  %v9250_v43 = vld [vmem:[%s8832_s21 + $0x140] sm:$0xff]  ;;  %v9264_v41 = vld [vmem:[%s8832_s21 + $0x148] sm:$0xff]  ;;  %10570 = vst [vmem:[#allocation43_spill] sm:$0xff] %v9343_v23 }
  0x43   : > { %7548 = vmatmul.mubr.msk.f32.gmra.mrb[18].mxu0 %vm323_vm1, %v9032_v44  ;;  %v9247_v44 = vld [vmem:[%s8832_s21 + $0x80] sm:$0xff] }
  0x44   : > { %7890 = vmatmul.mubr.msk.f32.gmra.mrb[18].mxu1 %vm323_vm1, %v9035_v45  ;;  %7550 = vmatprep.mubr.msk.f32.mxu0 %vm323_vm1, %v9038_v46  ;;  %v9241_v46 = vld [vmem:[%s8832_s21 + $0x78] sm:$0xff] }
  0x45   : > { %7892 = vmatprep.mubr.msk.f32.mxu1 %vm323_vm1, %v9041_v47  ;;  %v9230_v47 = vld [vmem:[%s8832_s21 + $0x130] sm:$0xff]  ;;  %v9244_v45 = vld [vmem:[%s8832_s21 + $0x138] sm:$0xff] }
  0x47   : > { %7551 = vmatmul.mubr.msk.f32.gmra.mrb[20].mxu0 %vm323_vm1, %v9052_v48  ;;  %v9227_v48 = vld [vmem:[%s8832_s21 + $0x70] sm:$0xff] }
  0x48   : > { %7893 = vmatmul.mubr.msk.f32.gmra.mrb[20].mxu1 %vm323_vm1, %v9055_v49  ;;  %7553 = vmatprep.mubr.msk.f32.mxu0 %vm323_vm1, %v9058_v50  ;;  %v9221_v50 = vld [vmem:[%s8832_s21 + $0x68] sm:$0xff] }
  0x49   : > { %7895 = vmatprep.mubr.msk.f32.mxu1 %vm323_vm1, %v9061_v51  ;;  %v9210_v51 = vld [vmem:[%s8832_s21 + $0x120] sm:$0xff]  ;;  %v9224_v49 = vld [vmem:[%s8832_s21 + $0x128] sm:$0xff] }
  0x4b   : > { %7554 = vmatmul.mubr.msk.f32.gmra.mrb[22].mxu0 %vm323_vm1, %v9072_v52  ;;  %v9207_v52 = vld [vmem:[%s8832_s21 + $0x60] sm:$0xff] }
  0x4c   : > { %7896 = vmatmul.mubr.msk.f32.gmra.mrb[22].mxu1 %vm323_vm1, %v9075_v53  ;;  %7558 = vmatprep.mubr.msk.f32.mxu0 %vm323_vm1, %v270_v54  ;;  %v9170_v54 = vld [vmem:[%s8832_s21 + $0x100] sm:$0xff]  ;;  %v9204_v53 = vld [vmem:[%s8832_s21 + $0x118] sm:$0xff] }
  0x4d   : > { %7900 = vmatprep.mubr.msk.f32.mxu1 %vm323_vm1, %v9079_v55 }
  0x4f   : > { %7559 = vmatmul.mubr.msk.f32.vlgmr.msra.gmra.mrb[0].mxu0 %vm323_vm1, %v271_v56  ;;  %v9181_v56 = vld [vmem:[%s8832_s21 + $0x48] sm:$0xff] }
  0x50   : > { %7901 = vmatmul.mubr.msk.f32.vlgmr.msra.gmra.mrb[0].mxu1 %vm323_vm1, %v9090_v57  ;;  %7595 = vmatpush3.msk.msra.mxu0 %vm396_vm0, %v8855_v10  ;;  %v9164_v10 = vld [vmem:[%s8832_s21 + $0xf8] sm:$0xff] }
  0x51   : > { %7937 = vmatpush3.msk.msra.mxu1 %vm396_vm0, %v8860_v11  ;;  %7561 = vmatprep.mubr.msk.f32.mxu0 %vm323_vm1, %v272_v58  ;;  %v9167_v11 = vld [vmem:[%s8832_s21 + $0x40] sm:$0xff]  ;;  %v9184_v58 = vld [vmem:[%s8832_s21 + $0x108] sm:$0xff] }
  0x52   : > { %7903 = vmatprep.mubr.msk.f32.mxu1 %vm323_vm1, %v9094_v59  ;;  %7632 = vmatprep.subr.msk.mxu0 %vm396_vm0, %v9102_v60 }
  0x53   : > { %7974 = vmatprep.subr.msk.mxu1 %vm396_vm0, %v9107_v61  ;;  %7562 = vmatmul.mubr.msk.f32.gmra.mrb[2].mxu0 %vm323_vm1, %v9114_v62 }
  0x54   : > { %7904 = vmatmul.mubr.msk.f32.gmra.mrb[2].mxu1 %vm323_vm1, %v9117_v63  ;;  %7564 = vmatprep.mubr.msk.f32.mxu0 %vm323_vm1, %v9123_v0 }
  0x55   : > { %7906 = vmatprep.mubr.msk.f32.mxu1 %vm323_vm1, %v9126_v1 }
  0x57   : > { %7565 = vmatmul.mubr.msk.f32.gmra.mrb[4].mxu0 %vm323_vm1, %v9141_v2 }
  0x58   : > { %7907 = vmatmul.mubr.msk.f32.gmra.mrb[4].mxu1 %vm323_vm1, %v9144_v3  ;;  %7567 = vmatprep.mubr.msk.f32.mxu0 %vm323_vm1, %v9147_v4 }
  0x59   : > { %7909 = vmatprep.mubr.msk.f32.mxu1 %vm323_vm1, %v9150_v6 }
  0x5b   : > { %7568 = vmatmul.mubr.msk.f32.gmra.mrb[6].mxu0 %vm323_vm1, %v9161_v8 }
  0x5c   : > { %7910 = vmatmul.mubr.msk.f32.gmra.mrb[6].mxu1 %vm323_vm1, %v9164_v10  ;;  %7570 = vmatprep.mubr.msk.f32.mxu0 %vm323_vm1, %v9167_v11 }
  0x5d   : > { %7912 = vmatprep.mubr.msk.f32.mxu1 %vm323_vm1, %v9170_v54 }
  0x5f   : > { %7571 = vmatmul.mubr.msk.f32.gmra.mrb[8].mxu0 %vm323_vm1, %v9181_v56 }
  0x60   : > { %7913 = vmatmul.mubr.msk.f32.gmra.mrb[8].mxu1 %vm323_vm1, %v9184_v58  ;;  %7573 = vmatprep.mubr.msk.f32.mxu0 %vm323_vm1, %v9187_v9 }
  0x61   : > { %7915 = vmatprep.mubr.msk.f32.mxu1 %vm323_vm1, %v9190_v7 }
  0x63   : > { %7574 = vmatmul.mubr.msk.f32.gmra.mrb[10].mxu0 %vm323_vm1, %v9201_v5 }
  0x64   : > { %7916 = vmatmul.mubr.msk.f32.gmra.mrb[10].mxu1 %vm323_vm1, %v9204_v53  ;;  %7576 = vmatprep.mubr.msk.f32.mxu0 %vm323_vm1, %v9207_v52 }
  0x65   : > { %7918 = vmatprep.mubr.msk.f32.mxu1 %vm323_vm1, %v9210_v51 }
  0x67   : > { %7577 = vmatmul.mubr.msk.f32.gmra.mrb[12].mxu0 %vm323_vm1, %v9221_v50 }
  0x68   : > { %7919 = vmatmul.mubr.msk.f32.gmra.mrb[12].mxu1 %vm323_vm1, %v9224_v49  ;;  %7579 = vmatprep.mubr.msk.f32.mxu0 %vm323_vm1, %v9227_v48 }
  0x69   : > { %7921 = vmatprep.mubr.msk.f32.mxu1 %vm323_vm1, %v9230_v47 }
  0x6b   : > { %7580 = vmatmul.mubr.msk.f32.gmra.mrb[14].mxu0 %vm323_vm1, %v9241_v46 }
  0x6c   : > { %7922 = vmatmul.mubr.msk.f32.gmra.mrb[14].mxu1 %vm323_vm1, %v9244_v45  ;;  %7582 = vmatprep.mubr.msk.f32.mxu0 %vm323_vm1, %v9247_v44 }
  0x6d   : > { %7924 = vmatprep.mubr.msk.f32.mxu1 %vm323_vm1, %v9250_v43 }
  0x6f   : > { %7583 = vmatmul.mubr.msk.f32.gmra.mrb[16].mxu0 %vm323_vm1, %v9261_v42 }
  0x70   : > { %7925 = vmatmul.mubr.msk.f32.gmra.mrb[16].mxu1 %vm323_vm1, %v9264_v41  ;;  %7585 = vmatprep.mubr.msk.f32.mxu0 %vm323_vm1, %v9267_v40 }
  0x71   : > { %7927 = vmatprep.mubr.msk.f32.mxu1 %vm323_vm1, %v9270_v39 }
  0x73   : > { %7586 = vmatmul.mubr.msk.f32.gmra.mrb[18].mxu0 %vm323_vm1, %v9281_v38 }
  0x74   : > { %7928 = vmatmul.mubr.msk.f32.gmra.mrb[18].mxu1 %vm323_vm1, %v9284_v37  ;;  %7588 = vmatprep.mubr.msk.f32.mxu0 %vm323_vm1, %v9287_v36 }
  0x75   : > { %7930 = vmatprep.mubr.msk.f32.mxu1 %vm323_vm1, %v9290_v35 }
  0x77   : > { %7589 = vmatmul.mubr.msk.f32.gmra.mrb[20].mxu0 %vm323_vm1, %v9301_v34 }
  0x78   : > { %7931 = vmatmul.mubr.msk.f32.gmra.mrb[20].mxu1 %vm323_vm1, %v9304_v33  ;;  %7591 = vmatprep.mubr.msk.f32.mxu0 %vm323_vm1, %v9307_v32 }
  0x79   : > { %7933 = vmatprep.mubr.msk.f32.mxu1 %vm323_vm1, %v9310_v31 }
  0x7b   : > { %7592 = vmatmul.mubr.msk.f32.gmra.mrb[22].mxu0 %vm323_vm1, %v9321_v30 }
  0x7c   : > { %7934 = vmatmul.mubr.msk.f32.gmra.mrb[22].mxu1 %vm323_vm1, %v9324_v29  ;;  %7596 = vmatprep.mubr.msk.f32.mxu0 %vm323_vm1, %v6264_v28  ;;  %v9351_v28 = vld [vmem:[%s10451_s1 + $0x10] sm:$0xf] }
  0x7d   : > { %7938 = vmatprep.mubr.msk.f32.mxu1 %vm323_vm1, %v9328_v27  ;;  %v9356_v27 = vld [vmem:[%s10451_s1 + $0x10] sm:$0xf] }
  0x7f   : > { %7597 = vmatmul.mubr.msk.f32.vlgmr.msra.gmra.mrb[0].mxu0 %vm323_vm1, %v6265_v26  ;;  %v9363_v26 = vld [vmem:[%s8832_s21 + $0x1a] sm:$0xff] }
  0x80   : > { %7939 = vmatmul.mubr.msk.f32.vlgmr.msra.gmra.mrb[0].mxu1 %vm323_vm1, %v9339_v25  ;;  %7633 = vmatpush3.msk.msra.mxu0 %vm396_vm0, %v9102_v60  ;;  %10571 = vst [vmem:[#allocation44_spill] sm:$0xff] %v9363_v26  ;;  %v9366_v25 = vld [vmem:[%s8832_s21 + $0xda] sm:$0xff]  ;;  %v9393_v60 = vld [vmem:[%s8832_s21 + $0xea] sm:$0xff] }
  0x81   : > { %7975 = vmatpush3.msk.msra.mxu1 %vm396_vm0, %v9107_v61  ;;  %10572 = vst [vmem:[#allocation45_spill] sm:$0xff] %v9366_v25  ;;  %7599 = vmatprep.mubr.msk.f32.mxu0 %vm323_vm1, %v6266_v24  ;;  %v9390_v24 = vld [vmem:[%s8832_s21 + $0x2a] sm:$0xff]  ;;  %10576 = vst [vmem:[#allocation49_spill] sm:$0xff] %v9393_v60  ;;  %v9396_v61 = vld [vmem:[%s8832_s21 + $0x32] sm:$0xff] }
  0x82   : > { %7941 = vmatprep.mubr.msk.f32.mxu1 %vm323_vm1, %v9343_v23  ;;  %7670 = vmatprep.subr.msk.mxu0 %vm396_vm0, %v9351_v28  ;;  %10575 = vst [vmem:[#allocation48_spill] sm:$0xff] %v9390_v24  ;;  %10577 = vst [vmem:[#allocation50_spill] sm:$0xff] %v9396_v61  ;;  %v9399_v23 = vld [vmem:[%s8832_s21 + $0xf2] sm:$0xff] }
  0x83   : > { %8012 = vmatprep.subr.msk.mxu1 %vm396_vm0, %v9356_v27  ;;  %7600 = vmatmul.mubr.msk.f32.gmra.mrb[2].mxu0 %vm323_vm1, %v9363_v26  ;;  %10578 = vst [vmem:[#allocation51_spill] sm:$0xff] %v9399_v23  ;;  %v9419_v26 = vld [vmem:[%s8832_s21 + $0x102] sm:$0xff] }
  0x84   : > { %7942 = vmatmul.mubr.msk.f32.gmra.mrb[2].mxu1 %vm323_vm1, %v9366_v25  ;;  %7602 = vmatprep.mubr.msk.f32.mxu0 %vm323_vm1, %v9372_v22  ;;  %v9413_v22 = vld [vmem:[%s8832_s21 + $0xfa] sm:$0xff]  ;;  %v9416_v25 = vld [vmem:[%s8832_s21 + $0x42] sm:$0xff]  ;;  %10582 = vst [vmem:[#allocation55_spill] sm:$0xff] %v9419_v26 }
  0x85   : > { %7944 = vmatprep.mubr.msk.f32.mxu1 %vm323_vm1, %v9375_v21  ;;  %v9410_v21 = vld [vmem:[%s8832_s21 + $0x3a] sm:$0xff]  ;;  %10580 = vst [vmem:[#allocation53_spill] sm:$0xff] %v9413_v22  ;;  %10581 = vst [vmem:[#allocation54_spill] sm:$0xff] %v9416_v25 }
  0x86   : > { %10579 = vst [vmem:[#allocation52_spill] sm:$0xff] %v9410_v21 }
  0x87   : > { %7603 = vmatmul.mubr.msk.f32.gmra.mrb[4].mxu0 %vm323_vm1, %v9390_v24  ;;  %v9439_v24 = vld [vmem:[%s8832_s21 + $0x112] sm:$0xff] }
  0x88   : > { %7945 = vmatmul.mubr.msk.f32.gmra.mrb[4].mxu1 %vm323_vm1, %v9393_v60  ;;  %7605 = vmatprep.mubr.msk.f32.mxu0 %vm323_vm1, %v9396_v61  ;;  %v9433_v61 = vld [vmem:[%s8832_s21 + $0x10a] sm:$0xff]  ;;  %v9436_v60 = vld [vmem:[%s8832_s21 + $0x52] sm:$0xff]  ;;  %10586 = vst [vmem:[#allocation59_spill] sm:$0xff] %v9439_v24 }
  0x89   : > { %7947 = vmatprep.mubr.msk.f32.mxu1 %vm323_vm1, %v9399_v23  ;;  %v9430_v23 = vld [vmem:[%s8832_s21 + $0x4a] sm:$0xff]  ;;  %10584 = vst [vmem:[#allocation57_spill] sm:$0xff] %v9433_v61  ;;  %10585 = vst [vmem:[#allocation58_spill] sm:$0xff] %v9436_v60 }
  0x8a   : > { %10583 = vst [vmem:[#allocation56_spill] sm:$0xff] %v9430_v23 }
  0x8b   : > { %7606 = vmatmul.mubr.msk.f32.gmra.mrb[6].mxu0 %vm323_vm1, %v9410_v21  ;;  %v9459_v21 = vld [vmem:[%s8832_s21 + $0x122] sm:$0xff] }
  0x8c   : > { %7948 = vmatmul.mubr.msk.f32.gmra.mrb[6].mxu1 %vm323_vm1, %v9413_v22  ;;  %7608 = vmatprep.mubr.msk.f32.mxu0 %vm323_vm1, %v9416_v25  ;;  %v9453_v25 = vld [vmem:[%s8832_s21 + $0x11a] sm:$0xff]  ;;  %v9456_v22 = vld [vmem:[%s8832_s21 + $0x62] sm:$0xff]  ;;  %10590 = vst [vmem:[#allocation63_spill] sm:$0xff] %v9459_v21 }
  0x8d   : > { %7950 = vmatprep.mubr.msk.f32.mxu1 %vm323_vm1, %v9419_v26  ;;  %v9450_v26 = vld [vmem:[%s8832_s21 + $0x5a] sm:$0xff]  ;;  %10588 = vst [vmem:[#allocation61_spill] sm:$0xff] %v9453_v25  ;;  %10589 = vst [vmem:[#allocation62_spill] sm:$0xff] %v9456_v22 }
  0x8e   : > { %10587 = vst [vmem:[#allocation60_spill] sm:$0xff] %v9450_v26 }
  0x8f   : > { %7609 = vmatmul.mubr.msk.f32.gmra.mrb[8].mxu0 %vm323_vm1, %v9430_v23  ;;  %v9479_v23 = vld [vmem:[%s8832_s21 + $0x132] sm:$0xff] }
  0x90   : > { %7951 = vmatmul.mubr.msk.f32.gmra.mrb[8].mxu1 %vm323_vm1, %v9433_v61  ;;  %7611 = vmatprep.mubr.msk.f32.mxu0 %vm323_vm1, %v9436_v60  ;;  %v9473_v60 = vld [vmem:[%s8832_s21 + $0x12a] sm:$0xff]  ;;  %v9476_v61 = vld [vmem:[%s8832_s21 + $0x72] sm:$0xff]  ;;  %10594 = vst [vmem:[#allocation67_spill] sm:$0xff] %v9479_v23 }
  0x91   : > { %7953 = vmatprep.mubr.msk.f32.mxu1 %vm323_vm1, %v9439_v24  ;;  %v9470_v24 = vld [vmem:[%s8832_s21 + $0x6a] sm:$0xff]  ;;  %10592 = vst [vmem:[#allocation65_spill] sm:$0xff] %v9473_v60  ;;  %10593 = vst [vmem:[#allocation66_spill] sm:$0xff] %v9476_v61 }
  0x92   : > { %10591 = vst [vmem:[#allocation64_spill] sm:$0xff] %v9470_v24 }
  0x93   : > { %7612 = vmatmul.mubr.msk.f32.gmra.mrb[10].mxu0 %vm323_vm1, %v9450_v26  ;;  %v9499_v26 = vld [vmem:[%s8832_s21 + $0x142] sm:$0xff] }
  0x94   : > { %7954 = vmatmul.mubr.msk.f32.gmra.mrb[10].mxu1 %vm323_vm1, %v9453_v25  ;;  %7614 = vmatprep.mubr.msk.f32.mxu0 %vm323_vm1, %v9456_v22  ;;  %v9493_v22 = vld [vmem:[%s8832_s21 + $0x13a] sm:$0xff]  ;;  %v9496_v25 = vld [vmem:[%s8832_s21 + $0x82] sm:$0xff]  ;;  %10598 = vst [vmem:[#allocation71_spill] sm:$0xff] %v9499_v26 }
  0x95   : > { %7956 = vmatprep.mubr.msk.f32.mxu1 %vm323_vm1, %v9459_v21  ;;  %v9490_v21 = vld [vmem:[%s8832_s21 + $0x7a] sm:$0xff]  ;;  %10596 = vst [vmem:[#allocation69_spill] sm:$0xff] %v9493_v22  ;;  %10597 = vst [vmem:[#allocation70_spill] sm:$0xff] %v9496_v25 }
  0x96   : > { %10595 = vst [vmem:[#allocation68_spill] sm:$0xff] %v9490_v21 }
  0x97   : > { %7615 = vmatmul.mubr.msk.f32.gmra.mrb[12].mxu0 %vm323_vm1, %v9470_v24  ;;  %v9519_v24 = vld [vmem:[%s8832_s21 + $0x152] sm:$0xff] }
  0x98   : > { %7957 = vmatmul.mubr.msk.f32.gmra.mrb[12].mxu1 %vm323_vm1, %v9473_v60  ;;  %7617 = vmatprep.mubr.msk.f32.mxu0 %vm323_vm1, %v9476_v61  ;;  %v9513_v61 = vld [vmem:[%s8832_s21 + $0x14a] sm:$0xff]  ;;  %v9516_v60 = vld [vmem:[%s8832_s21 + $0x92] sm:$0xff]  ;;  %10602 = vst [vmem:[#allocation75_spill] sm:$0xff] %v9519_v24 }
  0x99   : > { %7959 = vmatprep.mubr.msk.f32.mxu1 %vm323_vm1, %v9479_v23  ;;  %v9510_v23 = vld [vmem:[%s8832_s21 + $0x8a] sm:$0xff]  ;;  %10600 = vst [vmem:[#allocation73_spill] sm:$0xff] %v9513_v61  ;;  %10601 = vst [vmem:[#allocation74_spill] sm:$0xff] %v9516_v60 }
  0x9a   : > { %10599 = vst [vmem:[#allocation72_spill] sm:$0xff] %v9510_v23 }
  0x9b   : > { %7618 = vmatmul.mubr.msk.f32.gmra.mrb[14].mxu0 %vm323_vm1, %v9490_v21  ;;  %v9539_v21 = vld [vmem:[%s8832_s21 + $0x162] sm:$0xff] }
  0x9c   : > { %7960 = vmatmul.mubr.msk.f32.gmra.mrb[14].mxu1 %vm323_vm1, %v9493_v22  ;;  %7620 = vmatprep.mubr.msk.f32.mxu0 %vm323_vm1, %v9496_v25  ;;  %v9533_v25 = vld [vmem:[%s8832_s21 + $0x15a] sm:$0xff]  ;;  %v9536_v22 = vld [vmem:[%s8832_s21 + $0xa2] sm:$0xff]  ;;  %10604 = vst [vmem:[#allocation77_spill] sm:$0xff] %v9539_v21 }
  0x9d   : > { %7962 = vmatprep.mubr.msk.f32.mxu1 %vm323_vm1, %v9499_v26  ;;  %v9530_v26 = vld [vmem:[%s8832_s21 + $0x9a] sm:$0xff]  ;;  %10603 = vst [vmem:[#allocation76_spill] sm:$0xff] %v9536_v22 }
  0x9f   : > { %7621 = vmatmul.mubr.msk.f32.gmra.mrb[16].mxu0 %vm323_vm1, %v9510_v23  ;;  %v9559_v23 = vld [vmem:[%s8832_s21 + $0x172] sm:$0xff] }
  0xa0   : > { %7963 = vmatmul.mubr.msk.f32.gmra.mrb[16].mxu1 %vm323_vm1, %v9513_v61  ;;  %7623 = vmatprep.mubr.msk.f32.mxu0 %vm323_vm1, %v9516_v60  ;;  %v9553_v60 = vld [vmem:[%s8832_s21 + $0x16a] sm:$0xff]  ;;  %v9556_v61 = vld [vmem:[%s8832_s21 + $0xb2] sm:$0xff]  ;;  %10605 = vst [vmem:[#allocation78_spill] sm:$0xff] %v9559_v23 }
  0xa1   : > { %7965 = vmatprep.mubr.msk.f32.mxu1 %vm323_vm1, %v9519_v24  ;;  %v9550_v24 = vld [vmem:[%s8832_s21 + $0xaa] sm:$0xff] }
  0xa3   : > { %7624 = vmatmul.mubr.msk.f32.gmra.mrb[18].mxu0 %vm323_vm1, %v9530_v26 }
  0xa4   : > { %7966 = vmatmul.mubr.msk.f32.gmra.mrb[18].mxu1 %vm323_vm1, %v9533_v25  ;;  %7626 = vmatprep.mubr.msk.f32.mxu0 %vm323_vm1, %v9536_v22  ;;  %v9573_v22 = vld [vmem:[%s8832_s21 + $0x17a] sm:$0xff] }
  0xa5   : > { %7968 = vmatprep.mubr.msk.f32.mxu1 %vm323_vm1, %v9539_v21  ;;  %v9570_v21 = vld [vmem:[%s8832_s21 + $0xba] sm:$0xff]  ;;  %10606 = vst [vmem:[#allocation79_spill] sm:$0xff] %v9573_v22 }
  0xa7   : > { %7627 = vmatmul.mubr.msk.f32.gmra.mrb[20].mxu0 %vm323_vm1, %v9550_v24 }
  0xa8   : > { %7969 = vmatmul.mubr.msk.f32.gmra.mrb[20].mxu1 %vm323_vm1, %v9553_v60  ;;  %7629 = vmatprep.mubr.msk.f32.mxu0 %vm323_vm1, %v9556_v61 }
  0xa9   : > { %7971 = vmatprep.mubr.msk.f32.mxu1 %vm323_vm1, %v9559_v23  ;;  %v6438_v23 = vld [vmem:[%s10451_s1 + $0x14] sm:$0xf] }
  0xab   : > { %7630 = vmatmul.mubr.msk.f32.gmra.mrb[22].mxu0 %vm323_vm1, %v9570_v21 }
  0xac   : > { %7972 = vmatmul.mubr.msk.f32.gmra.mrb[22].mxu1 %vm323_vm1, %v9573_v22  ;;  %7634 = vmatprep.mubr.msk.f32.mxu0 %vm323_vm1, %v9114_v62  ;;  %v6889_v22 = vld [vmem:[%s10451_s1 + $0x14] sm:$0xf]  ;;  %v9679_v62 = vld [vmem:[%s8832_s21 + $0x188] sm:$0xff] }
  0xad   : > { %7976 = vmatprep.mubr.msk.f32.mxu1 %vm323_vm1, %v9117_v63  ;;  %v9690_v63 = vld [vmem:[%s8832_s21 + $0x190] sm:$0xff] }
  0xaf   : > { %7635 = vmatmul.mubr.msk.f32.vlgmr.msra.gmra.mrb[0].mxu0 %vm323_vm1, %v9123_v0  ;;  %v10619_v0 = vld [vmem:[#allocation20_spill] sm:$0xff] }
  0xb0   : > { %7977 = vmatmul.mubr.msk.f32.vlgmr.msra.gmra.mrb[0].mxu1 %vm323_vm1, %v9126_v1  ;;  %7671 = vmatpush3.msk.msra.mxu0 %vm396_vm0, %v9351_v28  ;;  %v10620_v1 = vld [vmem:[#allocation21_spill] sm:$0xff]  ;;  %v10623_v28 = vld [vmem:[#allocation24_spill] sm:$0xff] }
  0xb1   : > { %8013 = vmatpush3.msk.msra.mxu1 %vm396_vm0, %v9356_v27  ;;  %7637 = vmatprep.mubr.msk.f32.mxu0 %vm323_vm1, %v9141_v2  ;;  %v9676_v27 = vld [vmem:[%s8832_s21 + $0x180] sm:$0xff] }
  0xb2   : > { %7979 = vmatprep.mubr.msk.f32.mxu1 %vm323_vm1, %v9144_v3  ;;  %7708 = vmatprep.subr.msk.mxu0 %vm396_vm0, %v6438_v23  ;;  %v10621_v2 = vld [vmem:[#allocation22_spill] sm:$0xff]  ;;  %v10622_v3 = vld [vmem:[#allocation23_spill] sm:$0xff] }
  0xb3   : > { %8050 = vmatprep.subr.msk.mxu1 %vm396_vm0, %v6889_v22  ;;  %7638 = vmatmul.mubr.msk.f32.gmra.mrb[2].mxu0 %vm323_vm1, %v9147_v4 }
  0xb4   : > { %7980 = vmatmul.mubr.msk.f32.gmra.mrb[2].mxu1 %vm323_vm1, %v9150_v6  ;;  %7640 = vmatprep.mubr.msk.f32.mxu0 %vm323_vm1, %v9161_v8 }
  0xb5   : > { %7982 = vmatprep.mubr.msk.f32.mxu1 %vm323_vm1, %v9164_v10 }
  0xb7   : > { %7641 = vmatmul.mubr.msk.f32.gmra.mrb[4].mxu0 %vm323_vm1, %v9167_v11 }
  0xb8   : > { %7983 = vmatmul.mubr.msk.f32.gmra.mrb[4].mxu1 %vm323_vm1, %v9170_v54  ;;  %7643 = vmatprep.mubr.msk.f32.mxu0 %vm323_vm1, %v9181_v56 }
  0xb9   : > { %7985 = vmatprep.mubr.msk.f32.mxu1 %vm323_vm1, %v9184_v58 }
  0xbb   : > { %7644 = vmatmul.mubr.msk.f32.gmra.mrb[6].mxu0 %vm323_vm1, %v9187_v9 }
  0xbc   : > { %7986 = vmatmul.mubr.msk.f32.gmra.mrb[6].mxu1 %vm323_vm1, %v9190_v7  ;;  %7646 = vmatprep.mubr.msk.f32.mxu0 %vm323_vm1, %v9201_v5 }
  0xbd   : > { %7988 = vmatprep.mubr.msk.f32.mxu1 %vm323_vm1, %v9204_v53 }
  0xbf   : > { %7647 = vmatmul.mubr.msk.f32.gmra.mrb[8].mxu0 %vm323_vm1, %v9207_v52 }
  0xc0   : > { %7989 = vmatmul.mubr.msk.f32.gmra.mrb[8].mxu1 %vm323_vm1, %v9210_v51  ;;  %7649 = vmatprep.mubr.msk.f32.mxu0 %vm323_vm1, %v9221_v50 }
  0xc1   : > { %7991 = vmatprep.mubr.msk.f32.mxu1 %vm323_vm1, %v9224_v49 }
  0xc3   : > { %7650 = vmatmul.mubr.msk.f32.gmra.mrb[10].mxu0 %vm323_vm1, %v9227_v48 }
  0xc4   : > { %7992 = vmatmul.mubr.msk.f32.gmra.mrb[10].mxu1 %vm323_vm1, %v9230_v47  ;;  %7652 = vmatprep.mubr.msk.f32.mxu0 %vm323_vm1, %v9241_v46 }
  0xc5   : > { %7994 = vmatprep.mubr.msk.f32.mxu1 %vm323_vm1, %v9244_v45 }
  0xc7   : > { %7653 = vmatmul.mubr.msk.f32.gmra.mrb[12].mxu0 %vm323_vm1, %v9247_v44 }
  0xc8   : > { %7995 = vmatmul.mubr.msk.f32.gmra.mrb[12].mxu1 %vm323_vm1, %v9250_v43  ;;  %7655 = vmatprep.mubr.msk.f32.mxu0 %vm323_vm1, %v9261_v42 }
  0xc9   : > { %7997 = vmatprep.mubr.msk.f32.mxu1 %vm323_vm1, %v9264_v41 }
  0xcb   : > { %7656 = vmatmul.mubr.msk.f32.gmra.mrb[14].mxu0 %vm323_vm1, %v9267_v40 }
  0xcc   : > { %7998 = vmatmul.mubr.msk.f32.gmra.mrb[14].mxu1 %vm323_vm1, %v9270_v39  ;;  %7658 = vmatprep.mubr.msk.f32.mxu0 %vm323_vm1, %v9281_v38 }
  0xcd   : > { %8000 = vmatprep.mubr.msk.f32.mxu1 %vm323_vm1, %v9284_v37 }
  0xcf   : > { %7659 = vmatmul.mubr.msk.f32.gmra.mrb[16].mxu0 %vm323_vm1, %v9287_v36 }
  0xd0   : > { %8001 = vmatmul.mubr.msk.f32.gmra.mrb[16].mxu1 %vm323_vm1, %v9290_v35  ;;  %7661 = vmatprep.mubr.msk.f32.mxu0 %vm323_vm1, %v9301_v34 }
  0xd1   : > { %8003 = vmatprep.mubr.msk.f32.mxu1 %vm323_vm1, %v9304_v33 }
  0xd3   : > { %7662 = vmatmul.mubr.msk.f32.gmra.mrb[18].mxu0 %vm323_vm1, %v9307_v32 }
  0xd4   : > { %8004 = vmatmul.mubr.msk.f32.gmra.mrb[18].mxu1 %vm323_vm1, %v9310_v31  ;;  %7664 = vmatprep.mubr.msk.f32.mxu0 %vm323_vm1, %v9321_v30 }
  0xd5   : > { %8006 = vmatprep.mubr.msk.f32.mxu1 %vm323_vm1, %v9324_v29 }
  0xd7   : > { %7665 = vmatmul.mubr.msk.f32.gmra.mrb[20].mxu0 %vm323_vm1, %v9079_v55  ;;  %v6488_v55 = vld [vmem:[%s10451_s1 + $0x18] sm:$0xf] }
  0xd8   : > { %8007 = vmatmul.mubr.msk.f32.gmra.mrb[20].mxu1 %vm323_vm1, %v9676_v27  ;;  %7667 = vmatprep.mubr.msk.f32.mxu0 %vm323_vm1, %v9090_v57  ;;  %v6939_v57 = vld [vmem:[%s10451_s1 + $0x18] sm:$0xf] }
  0xd9   : > { %8009 = vmatprep.mubr.msk.f32.mxu1 %vm323_vm1, %v9679_v62 }
  0xdb   : > { %7668 = vmatmul.mubr.msk.f32.gmra.mrb[22].mxu0 %vm323_vm1, %v9094_v59  ;;  %v10618_v59 = vld [vmem:[#allocation19_spill] sm:$0xff] }
  0xdc   : > { %8010 = vmatmul.mubr.msk.f32.gmra.mrb[22].mxu1 %vm323_vm1, %v9690_v63  ;;  %7672 = vmatprep.mubr.msk.f32.mxu0 %vm323_vm1, %v8865_v12  ;;  %v10607_v12 = vld [vmem:[#allocation8_spill] sm:$0xff] }
  0xdd   : > { %8014 = vmatprep.mubr.msk.f32.mxu1 %vm323_vm1, %v8868_v13  ;;  %v10608_v13 = vld [vmem:[#allocation9_spill] sm:$0xff] }
  0xdf   : > { %7673 = vmatmul.mubr.msk.f32.vlgmr.msra.gmra.mrb[0].mxu0 %vm323_vm1, %v8874_v14  ;;  %v10609_v14 = vld [vmem:[#allocation10_spill] sm:$0xff] }
  0xe0   : > { %8015 = vmatmul.mubr.msk.f32.vlgmr.msra.gmra.mrb[0].mxu1 %vm323_vm1, %v8877_v15  ;;  %7709 = vmatpush3.msk.msra.mxu0 %vm396_vm0, %v6438_v23  ;;  %v10610_v15 = vld [vmem:[#allocation11_spill] sm:$0xff]  ;;  %v10617_v23 = vld [vmem:[#allocation18_spill] sm:$0xff] }
  0xe1   : > { %8051 = vmatpush3.msk.msra.mxu1 %vm396_vm0, %v6889_v22  ;;  %7675 = vmatprep.mubr.msk.f32.mxu0 %vm323_vm1, %v8892_v16  ;;  %v10611_v16 = vld [vmem:[#allocation12_spill] sm:$0xff]  ;;  %v10616_v22 = vld [vmem:[#allocation17_spill] sm:$0xff] }
  0xe2   : > { %8017 = vmatprep.mubr.msk.f32.mxu1 %vm323_vm1, %v8895_v17  ;;  %7746 = vmatprep.subr.msk.mxu0 %vm396_vm0, %v6488_v55  ;;  %v10612_v17 = vld [vmem:[#allocation13_spill] sm:$0xff] }
  0xe3   : > { %8088 = vmatprep.subr.msk.mxu1 %vm396_vm0, %v6939_v57  ;;  %7676 = vmatmul.mubr.msk.f32.gmra.mrb[2].mxu0 %vm323_vm1, %v8898_v18  ;;  %v10613_v18 = vld [vmem:[#allocation14_spill] sm:$0xff] }
  0xe4   : > { %8018 = vmatmul.mubr.msk.f32.gmra.mrb[2].mxu1 %vm323_vm1, %v8901_v19  ;;  %7678 = vmatprep.mubr.msk.f32.mxu0 %vm323_vm1, %v8912_v20  ;;  %v10614_v19 = vld [vmem:[#allocation15_spill] sm:$0xff]  ;;  %v10615_v20 = vld [vmem:[#allocation16_spill] sm:$0xff] }
  0xe5   : > { %8020 = vmatprep.mubr.msk.f32.mxu1 %vm323_vm1, %v10607_v12  ;;  %v10624_v12 = vld [vmem:[#allocation25_spill] sm:$0xff] }
  0xe7   : > { %7679 = vmatmul.mubr.msk.f32.gmra.mrb[4].mxu0 %vm323_vm1, %v10608_v13  ;;  %v10625_v13 = vld [vmem:[#allocation26_spill] sm:$0xff] }
  0xe8   : > { %8021 = vmatmul.mubr.msk.f32.gmra.mrb[4].mxu1 %vm323_vm1, %v10609_v14  ;;  %7681 = vmatprep.mubr.msk.f32.mxu0 %vm323_vm1, %v10610_v15  ;;  %v10626_v14 = vld [vmem:[#allocation27_spill] sm:$0xff]  ;;  %v10627_v15 = vld [vmem:[#allocation28_spill] sm:$0xff] }
  0xe9   : > { %8023 = vmatprep.mubr.msk.f32.mxu1 %vm323_vm1, %v10611_v16  ;;  %v10628_v16 = vld [vmem:[#allocation29_spill] sm:$0xff] }
  0xeb   : > { %7682 = vmatmul.mubr.msk.f32.gmra.mrb[6].mxu0 %vm323_vm1, %v10612_v17  ;;  %v10629_v17 = vld [vmem:[#allocation30_spill] sm:$0xff] }
  0xec   : > { %8024 = vmatmul.mubr.msk.f32.gmra.mrb[6].mxu1 %vm323_vm1, %v10613_v18  ;;  %7684 = vmatprep.mubr.msk.f32.mxu0 %vm323_vm1, %v10614_v19  ;;  %v10630_v18 = vld [vmem:[#allocation31_spill] sm:$0xff]  ;;  %v10631_v19 = vld [vmem:[#allocation32_spill] sm:$0xff] }
  0xed   : > { %8026 = vmatprep.mubr.msk.f32.mxu1 %vm323_vm1, %v10615_v20  ;;  %v10632_v20 = vld [vmem:[#allocation33_spill] sm:$0xff] }
  0xef   : > { %7685 = vmatmul.mubr.msk.f32.gmra.mrb[8].mxu0 %vm323_vm1, %v10616_v22  ;;  %v10633_v22 = vld [vmem:[#allocation34_spill] sm:$0xff] }
  0xf0   : > { %8027 = vmatmul.mubr.msk.f32.gmra.mrb[8].mxu1 %vm323_vm1, %v10617_v23  ;;  %7687 = vmatprep.mubr.msk.f32.mxu0 %vm323_vm1, %v10618_v59  ;;  %v10634_v23 = vld [vmem:[#allocation35_spill] sm:$0xff]  ;;  %v10635_v59 = vld [vmem:[#allocation36_spill] sm:$0xff] }
  0xf1   : > { %8029 = vmatprep.mubr.msk.f32.mxu1 %vm323_vm1, %v10619_v0  ;;  %v10636_v0 = vld [vmem:[#allocation37_spill] sm:$0xff] }
  0xf3   : > { %7688 = vmatmul.mubr.msk.f32.gmra.mrb[10].mxu0 %vm323_vm1, %v10620_v1  ;;  %v10637_v1 = vld [vmem:[#allocation38_spill] sm:$0xff] }
  0xf4   : > { %8030 = vmatmul.mubr.msk.f32.gmra.mrb[10].mxu1 %vm323_vm1, %v10621_v2  ;;  %7690 = vmatprep.mubr.msk.f32.mxu0 %vm323_vm1, %v10622_v3  ;;  %v10638_v2 = vld [vmem:[#allocation39_spill] sm:$0xff]  ;;  %v10639_v3 = vld [vmem:[#allocation40_spill] sm:$0xff] }
  0xf5   : > { %8032 = vmatprep.mubr.msk.f32.mxu1 %vm323_vm1, %v10623_v28  ;;  %v9791_v28 = vld [vmem:[%s8832_s21 + $0x181] sm:$0xff] }
  0xf7   : > { %7691 = vmatmul.mubr.msk.f32.gmra.mrb[12].mxu0 %vm323_vm1, %v10624_v12  ;;  %v9794_v12 = vld [vmem:[%s8832_s21 + $0x189] sm:$0xff] }
  0xf8   : > { %8033 = vmatmul.mubr.msk.f32.gmra.mrb[12].mxu1 %vm323_vm1, %v10625_v13  ;;  %7693 = vmatprep.mubr.msk.f32.mxu0 %vm323_vm1, %v10626_v14  ;;  %v10640_v13 = vld [vmem:[#allocation5_spill] sm:$0xff]  ;;  %v10641_v14 = vld [vmem:[#allocation6_spill] sm:$0xff] }
  0xf9   : > { %8035 = vmatprep.mubr.msk.f32.mxu1 %vm323_vm1, %v10627_v15  ;;  %v9805_v15 = vld [vmem:[%s8832_s21 + $0x191] sm:$0xff] }
  0xfb   : > { %7694 = vmatmul.mubr.msk.f32.gmra.mrb[14].mxu0 %vm323_vm1, %v10628_v16  ;;  %v10642_v16 = vld [vmem:[#allocation7_spill] sm:$0xff] }
  0xfc   : > { %8036 = vmatmul.mubr.msk.f32.gmra.mrb[14].mxu1 %vm323_vm1, %v10629_v17  ;;  %7696 = vmatprep.mubr.msk.f32.mxu0 %vm323_vm1, %v10630_v18  ;;  %v10643_v17 = vld [vmem:[#allocation44_spill] sm:$0xff]  ;;  %v10644_v18 = vld [vmem:[#allocation45_spill] sm:$0xff] }
  0xfd   : > { %8038 = vmatprep.mubr.msk.f32.mxu1 %vm323_vm1, %v10631_v19  ;;  %v10645_v19 = vld [vmem:[#allocation46_spill] sm:$0xff] }
  0xff   : > { %7697 = vmatmul.mubr.msk.f32.gmra.mrb[16].mxu0 %vm323_vm1, %v10632_v20  ;;  %v10646_v20 = vld [vmem:[#allocation47_spill] sm:$0xff] }
 0x100   : > { %8039 = vmatmul.mubr.msk.f32.gmra.mrb[16].mxu1 %vm323_vm1, %v10633_v22  ;;  %7699 = vmatprep.mubr.msk.f32.mxu0 %vm323_vm1, %v10634_v23  ;;  %v6538_v22 = vld [vmem:[%s10451_s1 + $0x1c] sm:$0xf] }
 0x101   : > { %8041 = vmatprep.mubr.msk.f32.mxu1 %vm323_vm1, %v10635_v59  ;;  %v6989_v23 = vld [vmem:[%s10451_s1 + $0x1c] sm:$0xf]  ;;  %v10647_v59 = vld [vmem:[#allocation48_spill] sm:$0xff] }
 0x103   : > { %7700 = vmatmul.mubr.msk.f32.gmra.mrb[18].mxu0 %vm323_vm1, %v10636_v0  ;;  %v10648_v0 = vld [vmem:[#allocation49_spill] sm:$0xff] }
 0x104   : > { %8042 = vmatmul.mubr.msk.f32.gmra.mrb[18].mxu1 %vm323_vm1, %v10637_v1  ;;  %7702 = vmatprep.mubr.msk.f32.mxu0 %vm323_vm1, %v10638_v2  ;;  %v10649_v1 = vld [vmem:[#allocation50_spill] sm:$0xff]  ;;  %v10650_v2 = vld [vmem:[#allocation51_spill] sm:$0xff] }
 0x105   : > { %8044 = vmatprep.mubr.msk.f32.mxu1 %vm323_vm1, %v10639_v3  ;;  %v10651_v3 = vld [vmem:[#allocation52_spill] sm:$0xff] }
 0x107   : > { %7703 = vmatmul.mubr.msk.f32.gmra.mrb[20].mxu0 %vm323_vm1, %v10640_v13  ;;  %v10654_v13 = vld [vmem:[#allocation55_spill] sm:$0xff] }
 0x108   : > { %8045 = vmatmul.mubr.msk.f32.gmra.mrb[20].mxu1 %vm323_vm1, %v9791_v28  ;;  %7705 = vmatprep.mubr.msk.f32.mxu0 %vm323_vm1, %v10641_v14  ;;  %v10655_v14 = vld [vmem:[#allocation56_spill] sm:$0xff] }
 0x109   : > { %8047 = vmatprep.mubr.msk.f32.mxu1 %vm323_vm1, %v9794_v12 }
 0x10b   : > { %7706 = vmatmul.mubr.msk.f32.gmra.mrb[22].mxu0 %vm323_vm1, %v10642_v16  ;;  %v10656_v16 = vld [vmem:[#allocation57_spill] sm:$0xff] }
 0x10c   : > { %8048 = vmatmul.mubr.msk.f32.gmra.mrb[22].mxu1 %vm323_vm1, %v9805_v15  ;;  %7710 = vmatprep.mubr.msk.f32.mxu0 %vm323_vm1, %v10643_v17  ;;  %v10657_v17 = vld [vmem:[#allocation58_spill] sm:$0xff] }
 0x10d   : > { %8052 = vmatprep.mubr.msk.f32.mxu1 %vm323_vm1, %v10644_v18  ;;  %v10658_v18 = vld [vmem:[#allocation59_spill] sm:$0xff] }
 0x10f   : > { %7711 = vmatmul.mubr.msk.f32.vlgmr.msra.gmra.mrb[0].mxu0 %vm323_vm1, %v10645_v19  ;;  %v10659_v19 = vld [vmem:[#allocation60_spill] sm:$0xff] }
 0x110   : > { %8053 = vmatmul.mubr.msk.f32.vlgmr.msra.gmra.mrb[0].mxu1 %vm323_vm1, %v10646_v20  ;;  %7747 = vmatpush3.msk.msra.mxu0 %vm396_vm0, %v6488_v55  ;;  %v10652_v55 = vld [vmem:[#allocation53_spill] sm:$0xff] }
 0x111   : > { %8089 = vmatpush3.msk.msra.mxu1 %vm396_vm0, %v6939_v57  ;;  %7713 = vmatprep.mubr.msk.f32.mxu0 %vm323_vm1, %v10647_v59  ;;  %v10653_v57 = vld [vmem:[#allocation54_spill] sm:$0xff]  ;;  %v10660_v20 = vld [vmem:[#allocation61_spill] sm:$0xff] }
 0x112   : > { %8055 = vmatprep.mubr.msk.f32.mxu1 %vm323_vm1, %v10648_v0  ;;  %7784 = vmatprep.subr.msk.mxu0 %vm396_vm0, %v6538_v22  ;;  %v10661_v59 = vld [vmem:[#allocation62_spill] sm:$0xff]  ;;  %v10662_v0 = vld [vmem:[#allocation63_spill] sm:$0xff] }
 0x113   : > { %8126 = vmatprep.subr.msk.mxu1 %vm396_vm0, %v6989_v23  ;;  %7714 = vmatmul.mubr.msk.f32.gmra.mrb[2].mxu0 %vm323_vm1, %v10649_v1  ;;  %v10663_v1 = vld [vmem:[#allocation64_spill] sm:$0xff] }
 0x114   : > { %8056 = vmatmul.mubr.msk.f32.gmra.mrb[2].mxu1 %vm323_vm1, %v10650_v2  ;;  %7716 = vmatprep.mubr.msk.f32.mxu0 %vm323_vm1, %v10651_v3  ;;  %v10664_v2 = vld [vmem:[#allocation65_spill] sm:$0xff]  ;;  %v10665_v3 = vld [vmem:[#allocation66_spill] sm:$0xff] }
 0x115   : > { %8058 = vmatprep.mubr.msk.f32.mxu1 %vm323_vm1, %v10652_v55  ;;  %v10666_v55 = vld [vmem:[#allocation67_spill] sm:$0xff] }
 0x117   : > { %7717 = vmatmul.mubr.msk.f32.gmra.mrb[4].mxu0 %vm323_vm1, %v10653_v57  ;;  %v10667_v57 = vld [vmem:[#allocation68_spill] sm:$0xff] }
 0x118   : > { %8059 = vmatmul.mubr.msk.f32.gmra.mrb[4].mxu1 %vm323_vm1, %v10654_v13  ;;  %7719 = vmatprep.mubr.msk.f32.mxu0 %vm323_vm1, %v10655_v14  ;;  %v10668_v13 = vld [vmem:[#allocation69_spill] sm:$0xff]  ;;  %v10669_v14 = vld [vmem:[#allocation70_spill] sm:$0xff] }
 0x119   : > { %8061 = vmatprep.mubr.msk.f32.mxu1 %vm323_vm1, %v10656_v16  ;;  %v10670_v16 = vld [vmem:[#allocation71_spill] sm:$0xff] }
 0x11b   : > { %7720 = vmatmul.mubr.msk.f32.gmra.mrb[6].mxu0 %vm323_vm1, %v10657_v17  ;;  %v10671_v17 = vld [vmem:[#allocation72_spill] sm:$0xff] }
 0x11c   : > { %8062 = vmatmul.mubr.msk.f32.gmra.mrb[6].mxu1 %vm323_vm1, %v10658_v18  ;;  %7722 = vmatprep.mubr.msk.f32.mxu0 %vm323_vm1, %v10659_v19  ;;  %v10672_v18 = vld [vmem:[#allocation73_spill] sm:$0xff]  ;;  %v10673_v19 = vld [vmem:[#allocation74_spill] sm:$0xff] }
 0x11d   : > { %8064 = vmatprep.mubr.msk.f32.mxu1 %vm323_vm1, %v10660_v20  ;;  %v10674_v20 = vld [vmem:[#allocation75_spill] sm:$0xff] }
 0x11f   : > { %7723 = vmatmul.mubr.msk.f32.gmra.mrb[8].mxu0 %vm323_vm1, %v10661_v59  ;;  %v10675_v59 = vld [vmem:[#allocation76_spill] sm:$0xff] }
 0x120   : > { %8065 = vmatmul.mubr.msk.f32.gmra.mrb[8].mxu1 %vm323_vm1, %v10662_v0  ;;  %7725 = vmatprep.mubr.msk.f32.mxu0 %vm323_vm1, %v10663_v1  ;;  %v10676_v0 = vld [vmem:[#allocation77_spill] sm:$0xff]  ;;  %v9906_v1 = vld [vmem:[%s8832_s21 + $0x182] sm:$0xff] }
 0x121   : > { %8067 = vmatprep.mubr.msk.f32.mxu1 %vm323_vm1, %v10664_v2  ;;  %v9909_v2 = vld [vmem:[%s8832_s21 + $0x18a] sm:$0xff] }
 0x123   : > { %7726 = vmatmul.mubr.msk.f32.gmra.mrb[10].mxu0 %vm323_vm1, %v10665_v3  ;;  %v9937_v3 = vld [vmem:[%s10451_s1 + $0x20] sm:$0xf] }
 0x124   : > { %8068 = vmatmul.mubr.msk.f32.gmra.mrb[10].mxu1 %vm323_vm1, %v10666_v55  ;;  %7728 = vmatprep.mubr.msk.f32.mxu0 %vm323_vm1, %v10667_v57  ;;  %v9942_v55 = vld [vmem:[%s10451_s1 + $0x20] sm:$0xf]  ;;  %v6530_v57 = vld [vmem:[%s8832_s21 + $0xb1] sm:$0xff] }
 0x125   : > { %8070 = vmatprep.mubr.msk.f32.mxu1 %vm323_vm1, %v10668_v13  ;;  %v6981_v13 = vld [vmem:[%s8832_s21 + $0x171] sm:$0xff] }
 0x127   : > { %7729 = vmatmul.mubr.msk.f32.gmra.mrb[12].mxu0 %vm323_vm1, %v10669_v14  ;;  %v6531_v14 = vld [vmem:[%s8832_s21 + $0xb9] sm:$0xff] }
 0x128   : > { %8071 = vmatmul.mubr.msk.f32.gmra.mrb[12].mxu1 %vm323_vm1, %v10670_v16  ;;  %7731 = vmatprep.mubr.msk.f32.mxu0 %vm323_vm1, %v10671_v17  ;;  %v6982_v16 = vld [vmem:[%s8832_s21 + $0x179] sm:$0xff]  ;;  %v6532_v17 = vld [vmem:[%s8832_s21 + $0xc1] sm:$0xff] }
 0x129   : > { %8073 = vmatprep.mubr.msk.f32.mxu1 %vm323_vm1, %v10672_v18  ;;  %v6533_v18 = vld [vmem:[%s8832_s21 + $0xc9] sm:$0xff] }
 0x12b   : > { %7732 = vmatmul.mubr.msk.f32.gmra.mrb[14].mxu0 %vm323_vm1, %v10673_v19  ;;  %v6534_v19 = vld [vmem:[%s8832_s21 + $0xd1] sm:$0xff] }
 0x12c   : > { %8074 = vmatmul.mubr.msk.f32.gmra.mrb[14].mxu1 %vm323_vm1, %v10674_v20  ;;  %7734 = vmatprep.mubr.msk.f32.mxu0 %vm323_vm1, %v9530_v26  ;;  %v10677_v26 = vld [vmem:[#allocation78_spill] sm:$0xff] }
 0x12d   : > { %8076 = vmatprep.mubr.msk.f32.mxu1 %vm323_vm1, %v9533_v25  ;;  %v10678_v25 = vld [vmem:[#allocation79_spill] sm:$0xff]  ;;  %v6535_v20 = vld [vmem:[%s8832_s21 + $0xd9] sm:$0xff] }
 0x12f   : > { %7735 = vmatmul.mubr.msk.f32.gmra.mrb[16].mxu0 %vm323_vm1, %v10675_v59  ;;  %v6986_v59 = vld [vmem:[%s8832_s21 + $0x199] sm:$0xff] }
 0x130   : > { %8077 = vmatmul.mubr.msk.f32.gmra.mrb[16].mxu1 %vm323_vm1, %v10676_v0  ;;  %7737 = vmatprep.mubr.msk.f32.mxu0 %vm323_vm1, %v9550_v24  ;;  %v10679_v24 = vld [vmem:[#allocation41_spill] sm:$0xff]  ;;  %v6987_v0 = vld [vmem:[%s8832_s21 + $0x1a1] sm:$0xff] }
 0x131   : > { %8079 = vmatprep.mubr.msk.f32.mxu1 %vm323_vm1, %v9553_v60  ;;  %v10680_v60 = vld [vmem:[#allocation42_spill] sm:$0xff] }
 0x133   : > { %7738 = vmatmul.mubr.msk.f32.gmra.mrb[18].mxu0 %vm323_vm1, %v9556_v61  ;;  %v10681_v61 = vld [vmem:[#allocation43_spill] sm:$0xff] }
 0x134   : > { %8080 = vmatmul.mubr.msk.f32.gmra.mrb[18].mxu1 %vm323_vm1, %v10677_v26  ;;  %7740 = vmatprep.mubr.msk.f32.mxu0 %vm323_vm1, %v9570_v21  ;;  %v9920_v21 = vld [vmem:[%s8832_s21 + $0x192] sm:$0xff]  ;;  %v6988_v26 = vld [vmem:[%s8832_s21 + $0x1a9] sm:$0xff] }
 0x135   : > { %8082 = vmatprep.mubr.msk.f32.mxu1 %vm323_vm1, %v10678_v25  ;;  %v7015_v25 = vld [vmem:[%s8832_s21 + $0xf2] sm:$0xff] }
 0x137   : > { %7741 = vmatmul.mubr.msk.f32.gmra.mrb[20].mxu0 %vm323_vm1, %v10679_v24  ;;  %v6565_v24 = vld [vmem:[%s8832_s21 + $0x3a] sm:$0xff] }
 0x138   : > { %8083 = vmatmul.mubr.msk.f32.gmra.mrb[20].mxu1 %vm323_vm1, %v9906_v1  ;;  %7743 = vmatprep.mubr.msk.f32.mxu0 %vm323_vm1, %v10680_v60  ;;  %v7016_v60 = vld [vmem:[%s8832_s21 + $0xfa] sm:$0xff] }
 0x139   : > { %8085 = vmatprep.mubr.msk.f32.mxu1 %vm323_vm1, %v9909_v2 }
 0x13b   : > { %7744 = vmatmul.mubr.msk.f32.gmra.mrb[22].mxu0 %vm323_vm1, %v10681_v61  ;;  %v6566_v61 = vld [vmem:[%s8832_s21 + $0x42] sm:$0xff] }
 0x13c   : > { %8086 = vmatmul.mubr.msk.f32.gmra.mrb[22].mxu1 %vm323_vm1, %v9920_v21  ;;  %7748 = vmatprep.mubr.msk.f32.mxu0 %vm323_vm1, %v9147_v4  ;;  %v6974_v4 = vld [vmem:[%s8832_s21 + $0x139] sm:$0xff] }
 0x13d   : > { %8090 = vmatprep.mubr.msk.f32.mxu1 %vm323_vm1, %v9150_v6  ;;  %v6524_v6 = vld [vmem:[%s8832_s21 + $0x81] sm:$0xff] }
 0x13f   : > { %7749 = vmatmul.mubr.msk.f32.vlgmr.msra.gmra.mrb[0].mxu0 %vm323_vm1, %v9161_v8  ;;  %v6975_v8 = vld [vmem:[%s8832_s21 + $0x141] sm:$0xff] }
 0x140   : > { %8091 = vmatmul.mubr.msk.f32.vlgmr.msra.gmra.mrb[0].mxu1 %vm323_vm1, %v9164_v10  ;;  %7785 = vmatpush3.msk.msra.mxu0 %vm396_vm0, %v6538_v22  ;;  %v6525_v10 = vld [vmem:[%s8832_s21 + $0x89] sm:$0xff] }
 0x141   : > { %8127 = vmatpush3.msk.msra.mxu1 %vm396_vm0, %v6989_v23  ;;  %7751 = vmatprep.mubr.msk.f32.mxu0 %vm323_vm1, %v9167_v11  ;;  %v6976_v11 = vld [vmem:[%s8832_s21 + $0x149] sm:$0xff] }
 0x142   : > { %8093 = vmatprep.mubr.msk.f32.mxu1 %vm323_vm1, %v9170_v54  ;;  %7822 = vmatprep.subr.msk.mxu0 %vm396_vm0, %v9937_v3  ;;  %v6526_v54 = vld [vmem:[%s8832_s21 + $0x91] sm:$0xff]  ;;  %v6529_v22 = vld [vmem:[%s8832_s21 + $0xa9] sm:$0xff] }
 0x143   : > { %8164 = vmatprep.subr.msk.mxu1 %vm396_vm0, %v9942_v55  ;;  %7752 = vmatmul.mubr.msk.f32.gmra.mrb[2].mxu0 %vm323_vm1, %v9181_v56  ;;  %v6977_v56 = vld [vmem:[%s8832_s21 + $0x151] sm:$0xff]  ;;  %v6980_v23 = vld [vmem:[%s8832_s21 + $0x169] sm:$0xff] }
 0x144   : > { %8094 = vmatmul.mubr.msk.f32.gmra.mrb[2].mxu1 %vm323_vm1, %v9184_v58  ;;  %7754 = vmatprep.mubr.msk.f32.mxu0 %vm323_vm1, %v9187_v9  ;;  %v6484_v9 = vld [vmem:[%s8832_s21 + $0xd0] sm:$0xff]  ;;  %v6527_v58 = vld [vmem:[%s8832_s21 + $0x99] sm:$0xff] }
 0x145   : > { %8096 = vmatprep.mubr.msk.f32.mxu1 %vm323_vm1, %v9190_v7  ;;  %v6483_v7 = vld [vmem:[%s8832_s21 + $0xc8] sm:$0xff] }
 0x147   : > { %7755 = vmatmul.mubr.msk.f32.gmra.mrb[4].mxu0 %vm323_vm1, %v9201_v5  ;;  %v6482_v5 = vld [vmem:[%s8832_s21 + $0xc0] sm:$0xff] }
 0x148   : > { %8097 = vmatmul.mubr.msk.f32.gmra.mrb[4].mxu1 %vm323_vm1, %v9204_v53  ;;  %7757 = vmatprep.mubr.msk.f32.mxu0 %vm323_vm1, %v9207_v52  ;;  %v6973_v52 = vld [vmem:[%s8832_s21 + $0x131] sm:$0xff]  ;;  %v6523_v53 = vld [vmem:[%s8832_s21 + $0x79] sm:$0xff] }
 0x149   : > { %8099 = vmatprep.mubr.msk.f32.mxu1 %vm323_vm1, %v9210_v51  ;;  %v6522_v51 = vld [vmem:[%s8832_s21 + $0x71] sm:$0xff] }
 0x14b   : > { %7758 = vmatmul.mubr.msk.f32.gmra.mrb[6].mxu0 %vm323_vm1, %v9221_v50  ;;  %v6972_v50 = vld [vmem:[%s8832_s21 + $0x129] sm:$0xff] }
 0x14c   : > { %8100 = vmatmul.mubr.msk.f32.gmra.mrb[6].mxu1 %vm323_vm1, %v9224_v49  ;;  %7760 = vmatprep.mubr.msk.f32.mxu0 %vm323_vm1, %v9227_v48  ;;  %v6971_v48 = vld [vmem:[%s8832_s21 + $0x121] sm:$0xff]  ;;  %v6521_v49 = vld [vmem:[%s8832_s21 + $0x69] sm:$0xff] }
 0x14d   : > { %8102 = vmatprep.mubr.msk.f32.mxu1 %vm323_vm1, %v9230_v47  ;;  %v6520_v47 = vld [vmem:[%s8832_s21 + $0x61] sm:$0xff] }
 0x14f   : > { %7761 = vmatmul.mubr.msk.f32.gmra.mrb[8].mxu0 %vm323_vm1, %v9241_v46  ;;  %v6970_v46 = vld [vmem:[%s8832_s21 + $0x119] sm:$0xff] }
 0x150   : > { %8103 = vmatmul.mubr.msk.f32.gmra.mrb[8].mxu1 %vm323_vm1, %v9244_v45  ;;  %7763 = vmatprep.mubr.msk.f32.mxu0 %vm323_vm1, %v9247_v44  ;;  %v6969_v44 = vld [vmem:[%s8832_s21 + $0x111] sm:$0xff]  ;;  %v6519_v45 = vld [vmem:[%s8832_s21 + $0x59] sm:$0xff] }
 0x151   : > { %8105 = vmatprep.mubr.msk.f32.mxu1 %vm323_vm1, %v9250_v43  ;;  %v6518_v43 = vld [vmem:[%s8832_s21 + $0x51] sm:$0xff] }
 0x153   : > { %7764 = vmatmul.mubr.msk.f32.gmra.mrb[10].mxu0 %vm323_vm1, %v9261_v42  ;;  %v6968_v42 = vld [vmem:[%s8832_s21 + $0x109] sm:$0xff] }
 0x154   : > { %8106 = vmatmul.mubr.msk.f32.gmra.mrb[10].mxu1 %vm323_vm1, %v9264_v41  ;;  %7766 = vmatprep.mubr.msk.f32.mxu0 %vm323_vm1, %v9267_v40  ;;  %v6967_v40 = vld [vmem:[%s8832_s21 + $0x101] sm:$0xff]  ;;  %v6517_v41 = vld [vmem:[%s8832_s21 + $0x49] sm:$0xff] }
 0x155   : > { %8108 = vmatprep.mubr.msk.f32.mxu1 %vm323_vm1, %v9270_v39  ;;  %v6516_v39 = vld [vmem:[%s8832_s21 + $0x41] sm:$0xff] }
 0x157   : > { %7767 = vmatmul.mubr.msk.f32.gmra.mrb[12].mxu0 %vm323_vm1, %v9281_v38  ;;  %v6966_v38 = vld [vmem:[%s8832_s21 + $0xf9] sm:$0xff] }
 0x158   : > { %8109 = vmatmul.mubr.msk.f32.gmra.mrb[12].mxu1 %vm323_vm1, %v9284_v37  ;;  %7769 = vmatprep.mubr.msk.f32.mxu0 %vm323_vm1, %v9287_v36  ;;  %v6965_v36 = vld [vmem:[%s8832_s21 + $0xf1] sm:$0xff]  ;;  %v6515_v37 = vld [vmem:[%s8832_s21 + $0x39] sm:$0xff] }
 0x159   : > { %8111 = vmatprep.mubr.msk.f32.mxu1 %vm323_vm1, %v9290_v35  ;;  %v6514_v35 = vld [vmem:[%s8832_s21 + $0x31] sm:$0xff] }
 0x15b   : > { %7770 = vmatmul.mubr.msk.f32.gmra.mrb[14].mxu0 %vm323_vm1, %v9301_v34  ;;  %v6938_v34 = vld [vmem:[%s8832_s21 + $0x1a8] sm:$0xff] }
 0x15c   : > { %8112 = vmatmul.mubr.msk.f32.gmra.mrb[14].mxu1 %vm323_vm1, %v9304_v33  ;;  %7772 = vmatprep.mubr.msk.f32.mxu0 %vm323_vm1, %v9307_v32  ;;  %v6937_v32 = vld [vmem:[%s8832_s21 + $0x1a0] sm:$0xff]  ;;  %v6487_v33 = vld [vmem:[%s8832_s21 + $0xe8] sm:$0xff] }
 0x15d   : > { %8114 = vmatprep.mubr.msk.f32.mxu1 %vm323_vm1, %v9310_v31  ;;  %v6486_v31 = vld [vmem:[%s8832_s21 + $0xe0] sm:$0xff] }
 0x15f   : > { %7773 = vmatmul.mubr.msk.f32.gmra.mrb[16].mxu0 %vm323_vm1, %v9321_v30  ;;  %v6936_v30 = vld [vmem:[%s8832_s21 + $0x198] sm:$0xff] }
 0x160   : > { %8115 = vmatmul.mubr.msk.f32.gmra.mrb[16].mxu1 %vm323_vm1, %v9324_v29  ;;  %7775 = vmatprep.mubr.msk.f32.mxu0 %vm323_vm1, %v6482_v5  ;;  %v6485_v29 = vld [vmem:[%s8832_s21 + $0xd8] sm:$0xff]  ;;  %v7018_v5 = vld [vmem:[%s8832_s21 + $0x10a] sm:$0xff] }
 0x161   : > { %8117 = vmatprep.mubr.msk.f32.mxu1 %vm323_vm1, %v9676_v27  ;;  %v6978_v27 = vld [vmem:[%s8832_s21 + $0x159] sm:$0xff] }
 0x163   : > { %7776 = vmatmul.mubr.msk.f32.gmra.mrb[18].mxu0 %vm323_vm1, %v6483_v7  ;;  %v6568_v7 = vld [vmem:[%s8832_s21 + $0x52] sm:$0xff] }
 0x164   : > { %8118 = vmatmul.mubr.msk.f32.gmra.mrb[18].mxu1 %vm323_vm1, %v9679_v62  ;;  %7778 = vmatprep.mubr.msk.f32.mxu0 %vm323_vm1, %v6484_v9  ;;  %v6528_v62 = vld [vmem:[%s8832_s21 + $0xa1] sm:$0xff]  ;;  %v7019_v9 = vld [vmem:[%s8832_s21 + $0x112] sm:$0xff] }
 0x165   : > { %8120 = vmatprep.mubr.msk.f32.mxu1 %vm323_vm1, %v9690_v63  ;;  %v6979_v63 = vld [vmem:[%s8832_s21 + $0x161] sm:$0xff] }
 0x167   : > { %7779 = vmatmul.mubr.msk.f32.gmra.mrb[20].mxu0 %vm323_vm1, %v6485_v29  ;;  %v6569_v29 = vld [vmem:[%s8832_s21 + $0x5a] sm:$0xff] }
 0x168   : > { %8121 = vmatmul.mubr.msk.f32.gmra.mrb[20].mxu1 %vm323_vm1, %v6936_v30  ;;  %7781 = vmatprep.mubr.msk.f32.mxu0 %vm323_vm1, %v6486_v31  ;;  %v7020_v30 = vld [vmem:[%s8832_s21 + $0x11a] sm:$0xff]  ;;  %v6570_v31 = vld [vmem:[%s8832_s21 + $0x62] sm:$0xff] }
 0x169   : > { %8123 = vmatprep.mubr.msk.f32.mxu1 %vm323_vm1, %v6937_v32  ;;  %v7021_v32 = vld [vmem:[%s8832_s21 + $0x122] sm:$0xff] }
 0x16b   : > { %7782 = vmatmul.mubr.msk.f32.gmra.mrb[22].mxu0 %vm323_vm1, %v6487_v33  ;;  %v6571_v33 = vld [vmem:[%s8832_s21 + $0x6a] sm:$0xff] }
 0x16c   : > { %8124 = vmatmul.mubr.msk.f32.gmra.mrb[22].mxu1 %vm323_vm1, %v6938_v34  ;;  %7786 = vmatprep.mubr.msk.f32.mxu0 %vm323_vm1, %v6514_v35  ;;  %v7022_v34 = vld [vmem:[%s8832_s21 + $0x12a] sm:$0xff]  ;;  %v6572_v35 = vld [vmem:[%s8832_s21 + $0x72] sm:$0xff] }
 0x16d   : > { %8128 = vmatprep.mubr.msk.f32.mxu1 %vm323_vm1, %v6965_v36  ;;  %v7023_v36 = vld [vmem:[%s8832_s21 + $0x132] sm:$0xff] }
 0x16f   : > { %7787 = vmatmul.mubr.msk.f32.vlgmr.msra.gmra.mrb[0].mxu0 %vm323_vm1, %v6515_v37  ;;  %v6573_v37 = vld [vmem:[%s8832_s21 + $0x7a] sm:$0xff] }
 0x170   : > { %8129 = vmatmul.mubr.msk.f32.vlgmr.msra.gmra.mrb[0].mxu1 %vm323_vm1, %v6966_v38  ;;  %7823 = vmatpush3.msk.msra.mxu0 %vm396_vm0, %v9937_v3  ;;  %v7017_v3 = vld [vmem:[%s8832_s21 + $0x102] sm:$0xff]  ;;  %v7024_v38 = vld [vmem:[%s8832_s21 + $0x13a] sm:$0xff] }
 0x171   : > { %8165 = vmatpush3.msk.msra.mxu1 %vm396_vm0, %v9942_v55  ;;  %7789 = vmatprep.mubr.msk.f32.mxu0 %vm323_vm1, %v6516_v39  ;;  %v6567_v55 = vld [vmem:[%s8832_s21 + $0x4a] sm:$0xff]  ;;  %v6574_v39 = vld [vmem:[%s8832_s21 + $0x82] sm:$0xff] }
 0x172   : > { %8131 = vmatprep.mubr.msk.f32.mxu1 %vm323_vm1, %v6967_v40  ;;  %v7025_v40 = vld [vmem:[%s8832_s21 + $0x142] sm:$0xff] }
 0x173   : > { %7790 = vmatmul.mubr.msk.f32.gmra.mrb[2].mxu0 %vm323_vm1, %v6517_v41  ;;  %v6575_v41 = vld [vmem:[%s8832_s21 + $0x8a] sm:$0xff] }
 0x174   : > { %8132 = vmatmul.mubr.msk.f32.gmra.mrb[2].mxu1 %vm323_vm1, %v6968_v42  ;;  %7792 = vmatprep.mubr.msk.f32.mxu0 %vm323_vm1, %v6518_v43  ;;  %v7026_v42 = vld [vmem:[%s8832_s21 + $0x14a] sm:$0xff]  ;;  %v6576_v43 = vld [vmem:[%s8832_s21 + $0x92] sm:$0xff] }
 0x175   : > { %8134 = vmatprep.mubr.msk.f32.mxu1 %vm323_vm1, %v6969_v44  ;;  %v7027_v44 = vld [vmem:[%s8832_s21 + $0x152] sm:$0xff] }
 0x177   : > { %7793 = vmatmul.mubr.msk.f32.gmra.mrb[4].mxu0 %vm323_vm1, %v6519_v45  ;;  %v6577_v45 = vld [vmem:[%s8832_s21 + $0x9a] sm:$0xff] }
 0x178   : > { %8135 = vmatmul.mubr.msk.f32.gmra.mrb[4].mxu1 %vm323_vm1, %v6970_v46  ;;  %7795 = vmatprep.mubr.msk.f32.mxu0 %vm323_vm1, %v6520_v47  ;;  %v7028_v46 = vld [vmem:[%s8832_s21 + $0x15a] sm:$0xff]  ;;  %v6578_v47 = vld [vmem:[%s8832_s21 + $0xa2] sm:$0xff] }
 0x179   : > { %8137 = vmatprep.mubr.msk.f32.mxu1 %vm323_vm1, %v6971_v48  ;;  %v7029_v48 = vld [vmem:[%s8832_s21 + $0x162] sm:$0xff] }
 0x17b   : > { %7796 = vmatmul.mubr.msk.f32.gmra.mrb[6].mxu0 %vm323_vm1, %v6521_v49  ;;  %v6579_v49 = vld [vmem:[%s8832_s21 + $0xaa] sm:$0xff] }
 0x17c   : > { %8138 = vmatmul.mubr.msk.f32.gmra.mrb[6].mxu1 %vm323_vm1, %v6972_v50  ;;  %7798 = vmatprep.mubr.msk.f32.mxu0 %vm323_vm1, %v6522_v51  ;;  %v7030_v50 = vld [vmem:[%s8832_s21 + $0x16a] sm:$0xff]  ;;  %v6580_v51 = vld [vmem:[%s8832_s21 + $0xb2] sm:$0xff] }
 0x17d   : > { %8140 = vmatprep.mubr.msk.f32.mxu1 %vm323_vm1, %v6973_v52  ;;  %v7031_v52 = vld [vmem:[%s8832_s21 + $0x172] sm:$0xff] }
 0x17f   : > { %7799 = vmatmul.mubr.msk.f32.gmra.mrb[8].mxu0 %vm323_vm1, %v6523_v53  ;;  %v6581_v53 = vld [vmem:[%s8832_s21 + $0xba] sm:$0xff] }
 0x180   : > { %8141 = vmatmul.mubr.msk.f32.gmra.mrb[8].mxu1 %vm323_vm1, %v6974_v4  ;;  %7801 = vmatprep.mubr.msk.f32.mxu0 %vm323_vm1, %v6524_v6  ;;  %v7032_v4 = vld [vmem:[%s8832_s21 + $0x17a] sm:$0xff]  ;;  %v6582_v6 = vld [vmem:[%s8832_s21 + $0xc2] sm:$0xff] }
 0x181   : > { %8143 = vmatprep.mubr.msk.f32.mxu1 %vm323_vm1, %v6975_v8  ;;  %v6583_v8 = vld [vmem:[%s8832_s21 + $0xca] sm:$0xff] }
 0x183   : > { %7802 = vmatmul.mubr.msk.f32.gmra.mrb[10].mxu0 %vm323_vm1, %v6525_v10  ;;  %v6584_v10 = vld [vmem:[%s8832_s21 + $0xd2] sm:$0xff] }
 0x184   : > { %8144 = vmatmul.mubr.msk.f32.gmra.mrb[10].mxu1 %vm323_vm1, %v6976_v11  ;;  %7804 = vmatprep.mubr.msk.f32.mxu0 %vm323_vm1, %v6526_v54  ;;  %v6585_v11 = vld [vmem:[%s8832_s21 + $0xda] sm:$0xff] }
 0x185   : > { %8146 = vmatprep.mubr.msk.f32.mxu1 %vm323_vm1, %v6977_v56  ;;  %v7036_v54 = vld [vmem:[%s8832_s21 + $0x19a] sm:$0xff]  ;;  %v6586_v56 = vld [vmem:[%s8832_s21 + $0xe2] sm:$0xff] }
 0x187   : > { %7805 = vmatmul.mubr.msk.f32.gmra.mrb[12].mxu0 %vm323_vm1, %v6527_v58  ;;  %v7037_v58 = vld [vmem:[%s8832_s21 + $0x1a2] sm:$0xff] }
 0x188   : > { %8147 = vmatmul.mubr.msk.f32.gmra.mrb[12].mxu1 %vm323_vm1, %v6978_v27  ;;  %7807 = vmatprep.mubr.msk.f32.mxu0 %vm323_vm1, %v6528_v62  ;;  %v10245_v27 = vld [vmem:[%s10453_s3] ss:$0 sm:$0xff] }
 0x189   : > { %8149 = vmatprep.mubr.msk.f32.mxu1 %vm323_vm1, %v6979_v63 }
 0x18b   : > { %7808 = vmatmul.mubr.msk.f32.gmra.mrb[14].mxu0 %vm323_vm1, %v6529_v22 }
 0x18c   : > { %8150 = vmatmul.mubr.msk.f32.gmra.mrb[14].mxu1 %vm323_vm1, %v6980_v23  ;;  %7810 = vmatprep.mubr.msk.f32.mxu0 %vm323_vm1, %v6530_v57 }
 0x18d   : > { %8152 = vmatprep.mubr.msk.f32.mxu1 %vm323_vm1, %v6981_v13 }
 0x18f   : > { %7811 = vmatmul.mubr.msk.f32.gmra.mrb[16].mxu0 %vm323_vm1, %v6531_v14 }
 0x190   : > { %8153 = vmatmul.mubr.msk.f32.gmra.mrb[16].mxu1 %vm323_vm1, %v6982_v16  ;;  %7813 = vmatprep.mubr.msk.f32.mxu0 %vm323_vm1, %v6532_v17 }
 0x191   : > { %8155 = vmatprep.mubr.msk.f32.mxu1 %vm323_vm1, %v9791_v28  ;;  %v6536_v28 = vld [vmem:[%s8832_s21 + $0xe1] sm:$0xff] }
 0x193   : > { %7814 = vmatmul.mubr.msk.f32.gmra.mrb[18].mxu0 %vm323_vm1, %v6533_v18 }
 0x194   : > { %8156 = vmatmul.mubr.msk.f32.gmra.mrb[18].mxu1 %vm323_vm1, %v9794_v12  ;;  %7816 = vmatprep.mubr.msk.f32.mxu0 %vm323_vm1, %v6534_v19  ;;  %v6537_v12 = vld [vmem:[%s8832_s21 + $0xe9] sm:$0xff] }
 0x195   : > { %8158 = vmatprep.mubr.msk.f32.mxu1 %vm323_vm1, %v9805_v15  ;;  %v6564_v15 = vld [vmem:[%s8832_s21 + $0x32] sm:$0xff] }
 0x197   : > { %7817 = vmatmul.mubr.msk.f32.gmra.mrb[20].mxu0 %vm323_vm1, %v6535_v20 }
 0x198   : > { %8159 = vmatmul.mubr.msk.f32.gmra.mrb[20].mxu1 %vm323_vm1, %v6986_v59  ;;  %7819 = vmatprep.mubr.msk.f32.mxu0 %vm323_vm1, %v6536_v28 }
 0x199   : > { %8161 = vmatprep.mubr.msk.f32.mxu1 %vm323_vm1, %v6987_v0 }
 0x19b   : > { %7820 = vmatmul.mubr.msk.f32.gmra.mrb[22].mxu0 %vm323_vm1, %v6537_v12 }
 0x19c   : > { %8162 = vmatmul.mubr.msk.f32.gmra.mrb[22].mxu1 %vm323_vm1, %v6988_v26  ;;  %7824 = vmatprep.mubr.msk.f32.mxu0 %vm323_vm1, %v6564_v15 }
 0x19d   : > { %8166 = vmatprep.mubr.msk.f32.mxu1 %vm323_vm1, %v7015_v25 }
 0x19f   : > { %7825 = vmatmul.mubr.msk.f32.vlgmr.msra.gmra.mrb[0].mxu0 %vm323_vm1, %v6565_v24 }
 0x1a0   : > { %8167 = vmatmul.mubr.msk.f32.vlgmr.msra.gmra.mrb[0].mxu1 %vm323_vm1, %v7016_v60  ;;  %7827 = vmatprep.mubr.msk.f32.mxu0 %vm323_vm1, %v6566_v61 }
 0x1a1   : > { %8169 = vmatprep.mubr.msk.f32.mxu1 %vm323_vm1, %v7017_v3 }
 0x1a3   : > { %7828 = vmatmul.mubr.msk.f32.gmra.mrb[2].mxu0 %vm323_vm1, %v6567_v55 }
 0x1a4   : > { %8170 = vmatmul.mubr.msk.f32.gmra.mrb[2].mxu1 %vm323_vm1, %v7018_v5  ;;  %7830 = vmatprep.mubr.msk.f32.mxu0 %vm323_vm1, %v6568_v7 }
 0x1a5   : > { %8172 = vmatprep.mubr.msk.f32.mxu1 %vm323_vm1, %v7019_v9 }
 0x1a7   : > { %7831 = vmatmul.mubr.msk.f32.gmra.mrb[4].mxu0 %vm323_vm1, %v6569_v29 }
 0x1a8   : > { %8173 = vmatmul.mubr.msk.f32.gmra.mrb[4].mxu1 %vm323_vm1, %v7020_v30  ;;  %7833 = vmatprep.mubr.msk.f32.mxu0 %vm323_vm1, %v6570_v31 }
 0x1a9   : > { %8175 = vmatprep.mubr.msk.f32.mxu1 %vm323_vm1, %v7021_v32 }
 0x1ab   : > { %7834 = vmatmul.mubr.msk.f32.gmra.mrb[6].mxu0 %vm323_vm1, %v6571_v33 }
 0x1ac   : > { %8176 = vmatmul.mubr.msk.f32.gmra.mrb[6].mxu1 %vm323_vm1, %v7022_v34  ;;  %7836 = vmatprep.mubr.msk.f32.mxu0 %vm323_vm1, %v6572_v35 }
 0x1ad   : > { %8178 = vmatprep.mubr.msk.f32.mxu1 %vm323_vm1, %v7023_v36 }
 0x1af   : > { %7837 = vmatmul.mubr.msk.f32.gmra.mrb[8].mxu0 %vm323_vm1, %v6573_v37 }
 0x1b0   : > { %8179 = vmatmul.mubr.msk.f32.gmra.mrb[8].mxu1 %vm323_vm1, %v7024_v38  ;;  %7839 = vmatprep.mubr.msk.f32.mxu0 %vm323_vm1, %v6574_v39 }
 0x1b1   : > { %8181 = vmatprep.mubr.msk.f32.mxu1 %vm323_vm1, %v7025_v40 }
 0x1b3   : > { %7840 = vmatmul.mubr.msk.f32.gmra.mrb[10].mxu0 %vm323_vm1, %v6575_v41 }
 0x1b4   : > { %8182 = vmatmul.mubr.msk.f32.gmra.mrb[10].mxu1 %vm323_vm1, %v7026_v42  ;;  %7842 = vmatprep.mubr.msk.f32.mxu0 %vm323_vm1, %v6576_v43 }
 0x1b5   : > { %8184 = vmatprep.mubr.msk.f32.mxu1 %vm323_vm1, %v7027_v44 }
 0x1b7   : > { %7843 = vmatmul.mubr.msk.f32.gmra.mrb[12].mxu0 %vm323_vm1, %v6577_v45 }
 0x1b8   : > { %8185 = vmatmul.mubr.msk.f32.gmra.mrb[12].mxu1 %vm323_vm1, %v7028_v46  ;;  %7845 = vmatprep.mubr.msk.f32.mxu0 %vm323_vm1, %v6578_v47 }
 0x1b9   : > { %8187 = vmatprep.mubr.msk.f32.mxu1 %vm323_vm1, %v7029_v48 }
 0x1bb   : > { %7846 = vmatmul.mubr.msk.f32.gmra.mrb[14].mxu0 %vm323_vm1, %v6579_v49 }
 0x1bc   : > { %8188 = vmatmul.mubr.msk.f32.gmra.mrb[14].mxu1 %vm323_vm1, %v7030_v50  ;;  %7848 = vmatprep.mubr.msk.f32.mxu0 %vm323_vm1, %v6580_v51 }
 0x1bd   : > { %8190 = vmatprep.mubr.msk.f32.mxu1 %vm323_vm1, %v7031_v52 }
 0x1bf   : > { %7849 = vmatmul.mubr.msk.f32.gmra.mrb[16].mxu0 %vm323_vm1, %v6581_v53 }
 0x1c0   : > { %8191 = vmatmul.mubr.msk.f32.gmra.mrb[16].mxu1 %vm323_vm1, %v7032_v4  ;;  %7851 = vmatprep.mubr.msk.f32.mxu0 %vm323_vm1, %v6582_v6 }
 0x1c1   : > { %8193 = vmatprep.mubr.msk.f32.mxu1 %vm323_vm1, %v9906_v1  ;;  %v6587_v1 = vld [vmem:[%s8832_s21 + $0xea] sm:$0xff] }
 0x1c3   : > { %7852 = vmatmul.mubr.msk.f32.gmra.mrb[18].mxu0 %vm323_vm1, %v6583_v8 }
 0x1c4   : > { %8194 = vmatmul.mubr.msk.f32.gmra.mrb[18].mxu1 %vm323_vm1, %v9909_v2  ;;  %7854 = vmatprep.mubr.msk.f32.mxu0 %vm323_vm1, %v6584_v10  ;;  %v7038_v2 = vld [vmem:[%s8832_s21 + $0x1aa] sm:$0xff]  ;;  %s10259_s21 = scalar_lea.vmem [#allocation2], %s8586_s24 }
 0x1c5   : > { %8196 = vmatprep.mubr.msk.f32.mxu1 %vm323_vm1, %v9920_v21  ;;  %v10238_v21 = vld [vmem:[%s10452_s2] ss:$0 sm:$0xff]  ;;  %s6002_s5 = sshll.u32 %s10259_s21, 4  ;;  %s10396_s5 = int_to_ptr.vmem [resolvable:$true] %s6002_s5 }
 0x1c6   : > { %s8646_s9 = scalar_lea.vmem %s10396_s5, 6144  ;;  %p8653_p1 = scmp.lt.s32.totalorder %s10396_s5, %s8651_s11 }
 0x1c7   : > { %7855 = vmatmul.mubr.msk.f32.gmra.mrb[20].mxu0 %vm323_vm1, %v6585_v11  ;;  %p8647_p12 = scmp.ne.s32.totalorder %s10396_s5, %s8646_s9  ;;  %p8654_p2 = scmp.lt.s32.totalorder %s8652_s12, %s8646_s9 }
 0x1c8   : > { %8197 = vmatmul.mubr.msk.f32.gmra.mrb[20].mxu1 %vm323_vm1, %v7036_v54  ;;  %7857 = vmatprep.mubr.msk.f32.mxu0 %vm323_vm1, %v6586_v56 }
 0x1c9   : > { %8199 = vmatprep.mubr.msk.f32.mxu1 %vm323_vm1, %v7037_v58  ;;  %p8648_p13 = pnand %p8647_p12, %p8794_p4  ;;  %p8655_p3 = por %p8654_p2, %p8653_p1 }
 0x1cb   : > { %7858 = vmatmul.mubr.msk.f32.gmra.mrb[22].mxu0 %vm323_vm1, %v6587_v1  ;;  %p8649_p0 = pneg %p8648_p13 }
 0x1cc   : > { %8200 = vmatmul.mubr.msk.f32.gmra.mrb[22].mxu1 %vm323_vm1, %v7038_v2 }
 0x1cd   : > { %p8656_p5 = pnand %p8655_p3, %p8649_p0 }
 0x272   : > { %v7826_v62 = vpop.f32.mrb[0].mxu0 }
 0x273   : > { %v8168_v63 = vpop.f32.mrb[0].mxu1  ;;  %v3036_v22 = vmul.f32 %v7826_v62, %v10238_v21  ;;  %v2886_v57 = vpop.f32.mrb[1].mxu0 }
 0x274   : > { %v5890_v23 = vmul.f32 %v8168_v63, %v10238_v21  ;;  %v5746_v13 = vpop.f32.mrb[1].mxu1  ;;  %v3035_v14 = vmul.f32 %v10238_v21, %v2886_v57 }
 0x275   : > { %v5889_v16 = vmul.f32 %v10238_v21, %v5746_v13  ;;  %v3066_v17 = vadd.f32 %v10245_v27, %v3036_v22 }
 0x276   : > { %v5914_v18 = vadd.f32 %v10245_v27, %v5890_v23  ;;  %v3065_v19 = vadd.f32 %v10245_v27, %v3035_v14  ;;  %v7829_v59 = vpop.f32.mrb[2].mxu0 }
 0x277   : > { %v5913_v20 = vadd.f32 %v10245_v27, %v5889_v16  ;;  %v8171_v28 = vpop.f32.mrb[2].mxu1  ;;  %v3090_v0 = vmax.f32 %v3066_v17, 0.0  ;;  %v3038_v26 = vmul.f32 %v7829_v59, %v10238_v21  ;;  %v2896_v25 = vpop.f32.mrb[3].mxu0 }
 0x278   : > { %v5938_v12 = vmax.f32 %v5914_v18, 0.0  ;;  %v5892_v15 = vmul.f32 %v8171_v28, %v10238_v21  ;;  %v5756_v24 = vpop.f32.mrb[3].mxu1  ;;  %v3089_v60 = vmax.f32 %v3065_v19, 0.0  ;;  %v3037_v3 = vmul.f32 %v10238_v21, %v2896_v25 }
 0x279   : > { %v5937_v61 = vmax.f32 %v5913_v20, 0.0  ;;  %v5891_v55 = vmul.f32 %v10238_v21, %v5756_v24  ;;  %3114 = vst [vmem:[%s10259_s21 + $0x8] sm:$0xff] %v3090_v0  ;;  %v3068_v5 = vadd.f32 %v10245_v27, %v3038_v26 }
 0x27a   : > { %5962 = vst [vmem:[%s10259_s21 + $0xc8] sm:$0xff] %v5938_v12  ;;  %v5916_v7 = vadd.f32 %v10245_v27, %v5892_v15  ;;  %3113 = vst [vmem:[%s10259_s21] sm:$0xff] %v3089_v60  ;;  %v3067_v9 = vadd.f32 %v10245_v27, %v3037_v3  ;;  %v7832_v30 = vpop.f32.mrb[4].mxu0 }
 0x27b   : > { %5961 = vst [vmem:[%s10259_s21 + $0xc0] sm:$0xff] %v5937_v61  ;;  %v5915_v29 = vadd.f32 %v10245_v27, %v5891_v55  ;;  %v8174_v31 = vpop.f32.mrb[4].mxu1  ;;  %v3092_v32 = vmax.f32 %v3068_v5, 0.0  ;;  %v3040_v34 = vmul.f32 %v7832_v30, %v10238_v21  ;;  %v2906_v36 = vpop.f32.mrb[5].mxu0 }
 0x27c   : > { %v5940_v33 = vmax.f32 %v5916_v7, 0.0  ;;  %v5894_v35 = vmul.f32 %v8174_v31, %v10238_v21  ;;  %v5766_v37 = vpop.f32.mrb[5].mxu1  ;;  %v3091_v38 = vmax.f32 %v3067_v9, 0.0  ;;  %v3039_v40 = vmul.f32 %v10238_v21, %v2906_v36 }
 0x27d   : > { %v5939_v39 = vmax.f32 %v5915_v29, 0.0  ;;  %v5893_v41 = vmul.f32 %v10238_v21, %v5766_v37  ;;  %3116 = vst [vmem:[%s10259_s21 + $0x18] sm:$0xff] %v3092_v32  ;;  %v3070_v42 = vadd.f32 %v10245_v27, %v3040_v34 }
 0x27e   : > { %5964 = vst [vmem:[%s10259_s21 + $0xd8] sm:$0xff] %v5940_v33  ;;  %v5918_v43 = vadd.f32 %v10245_v27, %v5894_v35  ;;  %3115 = vst [vmem:[%s10259_s21 + $0x10] sm:$0xff] %v3091_v38  ;;  %v3069_v44 = vadd.f32 %v10245_v27, %v3039_v40  ;;  %v7835_v46 = vpop.f32.mrb[6].mxu0 }
 0x27f   : > { %5963 = vst [vmem:[%s10259_s21 + $0xd0] sm:$0xff] %v5939_v39  ;;  %v5917_v45 = vadd.f32 %v10245_v27, %v5893_v41  ;;  %v8177_v47 = vpop.f32.mrb[6].mxu1  ;;  %v3094_v48 = vmax.f32 %v3070_v42, 0.0  ;;  %v3042_v50 = vmul.f32 %v7835_v46, %v10238_v21  ;;  %v2916_v52 = vpop.f32.mrb[7].mxu0 }
 0x280   : > { %v5942_v49 = vmax.f32 %v5918_v43, 0.0  ;;  %v5896_v51 = vmul.f32 %v8177_v47, %v10238_v21  ;;  %v5776_v53 = vpop.f32.mrb[7].mxu1  ;;  %v3093_v4 = vmax.f32 %v3069_v44, 0.0  ;;  %v3041_v8 = vmul.f32 %v10238_v21, %v2916_v52 }
 0x281   : > { %v5941_v6 = vmax.f32 %v5917_v45, 0.0  ;;  %v5895_v10 = vmul.f32 %v10238_v21, %v5776_v53  ;;  %3118 = vst [vmem:[%s10259_s21 + $0x28] sm:$0xff] %v3094_v48  ;;  %v3072_v11 = vadd.f32 %v10245_v27, %v3042_v50 }
 0x282   : > { %5966 = vst [vmem:[%s10259_s21 + $0xe8] sm:$0xff] %v5942_v49  ;;  %v5920_v54 = vadd.f32 %v10245_v27, %v5896_v51  ;;  %3117 = vst [vmem:[%s10259_s21 + $0x20] sm:$0xff] %v3093_v4  ;;  %v3071_v56 = vadd.f32 %v10245_v27, %v3041_v8  ;;  %v7838_v1 = vpop.f32.mrb[8].mxu0 }
 0x283   : > { %5965 = vst [vmem:[%s10259_s21 + $0xe0] sm:$0xff] %v5941_v6  ;;  %v5919_v58 = vadd.f32 %v10245_v27, %v5895_v10  ;;  %v8180_v2 = vpop.f32.mrb[8].mxu1  ;;  %v3096_v62 = vmax.f32 %v3072_v11, 0.0  ;;  %v3044_v22 = vmul.f32 %v7838_v1, %v10238_v21  ;;  %v2926_v57 = vpop.f32.mrb[9].mxu0 }
 0x284   : > { %v5944_v63 = vmax.f32 %v5920_v54, 0.0  ;;  %v5898_v23 = vmul.f32 %v8180_v2, %v10238_v21  ;;  %v5786_v13 = vpop.f32.mrb[9].mxu1  ;;  %v3095_v14 = vmax.f32 %v3071_v56, 0.0  ;;  %v3043_v17 = vmul.f32 %v10238_v21, %v2926_v57 }
 0x285   : > { %v5943_v16 = vmax.f32 %v5919_v58, 0.0  ;;  %v5897_v18 = vmul.f32 %v10238_v21, %v5786_v13  ;;  %3120 = vst [vmem:[%s10259_s21 + $0x38] sm:$0xff] %v3096_v62  ;;  %v3074_v19 = vadd.f32 %v10245_v27, %v3044_v22 }
 0x286   : > { %5968 = vst [vmem:[%s10259_s21 + $0xf8] sm:$0xff] %v5944_v63  ;;  %v5922_v20 = vadd.f32 %v10245_v27, %v5898_v23  ;;  %3119 = vst [vmem:[%s10259_s21 + $0x30] sm:$0xff] %v3095_v14  ;;  %v3073_v59 = vadd.f32 %v10245_v27, %v3043_v17  ;;  %v7841_v0 = vpop.f32.mrb[10].mxu0 }
 0x287   : > { %5967 = vst [vmem:[%s10259_s21 + $0xf0] sm:$0xff] %v5943_v16  ;;  %v5921_v28 = vadd.f32 %v10245_v27, %v5897_v18  ;;  %v8183_v12 = vpop.f32.mrb[10].mxu1  ;;  %v3098_v26 = vmax.f32 %v3074_v19, 0.0  ;;  %v3046_v25 = vmul.f32 %v7841_v0, %v10238_v21  ;;  %v2936_v60 = vpop.f32.mrb[11].mxu0 }
 0x288   : > { %v5946_v15 = vmax.f32 %v5922_v20, 0.0  ;;  %v5900_v24 = vmul.f32 %v8183_v12, %v10238_v21  ;;  %v5796_v61 = vpop.f32.mrb[11].mxu1  ;;  %v3097_v3 = vmax.f32 %v3073_v59, 0.0  ;;  %v3045_v5 = vmul.f32 %v10238_v21, %v2936_v60 }
 0x289   : > { %v5945_v55 = vmax.f32 %v5921_v28, 0.0  ;;  %v5899_v7 = vmul.f32 %v10238_v21, %v5796_v61  ;;  %3122 = vst [vmem:[%s10259_s21 + $0x48] sm:$0xff] %v3098_v26  ;;  %v3076_v9 = vadd.f32 %v10245_v27, %v3046_v25 }
 0x28a   : > { %5970 = vst [vmem:[%s10259_s21 + $0x108] sm:$0xff] %v5946_v15  ;;  %v5924_v29 = vadd.f32 %v10245_v27, %v5900_v24  ;;  %3121 = vst [vmem:[%s10259_s21 + $0x40] sm:$0xff] %v3097_v3  ;;  %v3075_v30 = vadd.f32 %v10245_v27, %v3045_v5  ;;  %v7844_v32 = vpop.f32.mrb[12].mxu0 }
 0x28b   : > { %5969 = vst [vmem:[%s10259_s21 + $0x100] sm:$0xff] %v5945_v55  ;;  %v5923_v31 = vadd.f32 %v10245_v27, %v5899_v7  ;;  %v8186_v33 = vpop.f32.mrb[12].mxu1  ;;  %v3100_v34 = vmax.f32 %v3076_v9, 0.0  ;;  %v3048_v36 = vmul.f32 %v7844_v32, %v10238_v21  ;;  %v2946_v38 = vpop.f32.mrb[13].mxu0 }
 0x28c   : > { %v5948_v35 = vmax.f32 %v5924_v29, 0.0  ;;  %v5902_v37 = vmul.f32 %v8186_v33, %v10238_v21  ;;  %v5806_v39 = vpop.f32.mrb[13].mxu1  ;;  %v3099_v40 = vmax.f32 %v3075_v30, 0.0  ;;  %v3047_v42 = vmul.f32 %v10238_v21, %v2946_v38 }
 0x28d   : > { %v5947_v41 = vmax.f32 %v5923_v31, 0.0  ;;  %v5901_v43 = vmul.f32 %v10238_v21, %v5806_v39  ;;  %3124 = vst [vmem:[%s10259_s21 + $0x58] sm:$0xff] %v3100_v34  ;;  %v3078_v44 = vadd.f32 %v10245_v27, %v3048_v36 }
 0x28e   : > { %5972 = vst [vmem:[%s10259_s21 + $0x118] sm:$0xff] %v5948_v35  ;;  %v5926_v45 = vadd.f32 %v10245_v27, %v5902_v37  ;;  %3123 = vst [vmem:[%s10259_s21 + $0x50] sm:$0xff] %v3099_v40  ;;  %v3077_v46 = vadd.f32 %v10245_v27, %v3047_v42  ;;  %v7847_v48 = vpop.f32.mrb[14].mxu0 }
 0x28f   : > { %5971 = vst [vmem:[%s10259_s21 + $0x110] sm:$0xff] %v5947_v41  ;;  %v5925_v47 = vadd.f32 %v10245_v27, %v5901_v43  ;;  %v8189_v49 = vpop.f32.mrb[14].mxu1  ;;  %v3102_v50 = vmax.f32 %v3078_v44, 0.0  ;;  %v3050_v52 = vmul.f32 %v7847_v48, %v10238_v21  ;;  %v2956_v4 = vpop.f32.mrb[15].mxu0 }
 0x290   : > { %v5950_v51 = vmax.f32 %v5926_v45, 0.0  ;;  %v5904_v53 = vmul.f32 %v8189_v49, %v10238_v21  ;;  %v5816_v6 = vpop.f32.mrb[15].mxu1  ;;  %v3101_v8 = vmax.f32 %v3077_v46, 0.0  ;;  %v3049_v11 = vmul.f32 %v10238_v21, %v2956_v4 }
 0x291   : > { %v5949_v10 = vmax.f32 %v5925_v47, 0.0  ;;  %v5903_v54 = vmul.f32 %v10238_v21, %v5816_v6  ;;  %3126 = vst [vmem:[%s10259_s21 + $0x68] sm:$0xff] %v3102_v50  ;;  %v3080_v56 = vadd.f32 %v10245_v27, %v3050_v52 }
 0x292   : > { %5974 = vst [vmem:[%s10259_s21 + $0x128] sm:$0xff] %v5950_v51  ;;  %v5928_v58 = vadd.f32 %v10245_v27, %v5904_v53  ;;  %3125 = vst [vmem:[%s10259_s21 + $0x60] sm:$0xff] %v3101_v8  ;;  %v3079_v1 = vadd.f32 %v10245_v27, %v3049_v11  ;;  %v7850_v62 = vpop.f32.mrb[16].mxu0 }
 0x293   : > { %5973 = vst [vmem:[%s10259_s21 + $0x120] sm:$0xff] %v5949_v10  ;;  %v5927_v2 = vadd.f32 %v10245_v27, %v5903_v54  ;;  %v8192_v63 = vpop.f32.mrb[16].mxu1  ;;  %v3104_v22 = vmax.f32 %v3080_v56, 0.0  ;;  %v3052_v57 = vmul.f32 %v7850_v62, %v10238_v21  ;;  %v2966_v14 = vpop.f32.mrb[17].mxu0 }
 0x294   : > { %v5952_v23 = vmax.f32 %v5928_v58, 0.0  ;;  %v5906_v13 = vmul.f32 %v8192_v63, %v10238_v21  ;;  %v5826_v16 = vpop.f32.mrb[17].mxu1  ;;  %v3103_v17 = vmax.f32 %v3079_v1, 0.0  ;;  %v3051_v19 = vmul.f32 %v10238_v21, %v2966_v14 }
 0x295   : > { %v5951_v18 = vmax.f32 %v5927_v2, 0.0  ;;  %v5905_v20 = vmul.f32 %v10238_v21, %v5826_v16  ;;  %3128 = vst [vmem:[%s10259_s21 + $0x78] sm:$0xff] %v3104_v22  ;;  %v3082_v59 = vadd.f32 %v10245_v27, %v3052_v57 }
 0x296   : > { %5976 = vst [vmem:[%s10259_s21 + $0x138] sm:$0xff] %v5952_v23  ;;  %v5930_v28 = vadd.f32 %v10245_v27, %v5906_v13  ;;  %3127 = vst [vmem:[%s10259_s21 + $0x70] sm:$0xff] %v3103_v17  ;;  %v3081_v0 = vadd.f32 %v10245_v27, %v3051_v19  ;;  %v7853_v26 = vpop.f32.mrb[18].mxu0 }
 0x297   : > { %5975 = vst [vmem:[%s10259_s21 + $0x130] sm:$0xff] %v5951_v18  ;;  %v5929_v12 = vadd.f32 %v10245_v27, %v5905_v20  ;;  %v8195_v15 = vpop.f32.mrb[18].mxu1  ;;  %v3106_v25 = vmax.f32 %v3082_v59, 0.0  ;;  %v3054_v60 = vmul.f32 %v7853_v26, %v10238_v21  ;;  %v2976_v3 = vpop.f32.mrb[19].mxu0 }
 0x298   : > { %v5954_v24 = vmax.f32 %v5930_v28, 0.0  ;;  %v5908_v61 = vmul.f32 %v8195_v15, %v10238_v21  ;;  %v5836_v55 = vpop.f32.mrb[19].mxu1  ;;  %v3105_v5 = vmax.f32 %v3081_v0, 0.0  ;;  %v3053_v9 = vmul.f32 %v10238_v21, %v2976_v3 }
 0x299   : > { %v5953_v7 = vmax.f32 %v5929_v12, 0.0  ;;  %v5907_v29 = vmul.f32 %v10238_v21, %v5836_v55  ;;  %3130 = vst [vmem:[%s10259_s21 + $0x88] sm:$0xff] %v3106_v25  ;;  %v3084_v30 = vadd.f32 %v10245_v27, %v3054_v60 }
 0x29a   : > { %5978 = vst [vmem:[%s10259_s21 + $0x148] sm:$0xff] %v5954_v24  ;;  %v5932_v31 = vadd.f32 %v10245_v27, %v5908_v61  ;;  %3129 = vst [vmem:[%s10259_s21 + $0x80] sm:$0xff] %v3105_v5  ;;  %v3083_v32 = vadd.f32 %v10245_v27, %v3053_v9  ;;  %v7856_v34 = vpop.f32.mrb[20].mxu0 }
 0x29b   : > { %5977 = vst [vmem:[%s10259_s21 + $0x140] sm:$0xff] %v5953_v7  ;;  %v5931_v33 = vadd.f32 %v10245_v27, %v5907_v29  ;;  %v8198_v35 = vpop.f32.mrb[20].mxu1  ;;  %v3108_v36 = vmax.f32 %v3084_v30, 0.0  ;;  %v3056_v38 = vmul.f32 %v7856_v34, %v10238_v21  ;;  %v2986_v40 = vpop.f32.mrb[21].mxu0 }
 0x29c   : > { %v5956_v37 = vmax.f32 %v5932_v31, 0.0  ;;  %v5910_v39 = vmul.f32 %v8198_v35, %v10238_v21  ;;  %v5846_v41 = vpop.f32.mrb[21].mxu1  ;;  %v3107_v42 = vmax.f32 %v3083_v32, 0.0  ;;  %v3055_v44 = vmul.f32 %v10238_v21, %v2986_v40 }
 0x29d   : > { %v5955_v43 = vmax.f32 %v5931_v33, 0.0  ;;  %v5909_v45 = vmul.f32 %v10238_v21, %v5846_v41  ;;  %3132 = vst [vmem:[%s10259_s21 + $0x98] sm:$0xff] %v3108_v36  ;;  %v3086_v46 = vadd.f32 %v10245_v27, %v3056_v38 }
 0x29e   : > { %5980 = vst [vmem:[%s10259_s21 + $0x158] sm:$0xff] %v5956_v37  ;;  %v5934_v47 = vadd.f32 %v10245_v27, %v5910_v39  ;;  %3131 = vst [vmem:[%s10259_s21 + $0x90] sm:$0xff] %v3107_v42  ;;  %v3085_v48 = vadd.f32 %v10245_v27, %v3055_v44  ;;  %v7859_v50 = vpop.f32.mrb[22].mxu0 }
 0x29f   : > { %5979 = vst [vmem:[%s10259_s21 + $0x150] sm:$0xff] %v5955_v43  ;;  %v5933_v49 = vadd.f32 %v10245_v27, %v5909_v45  ;;  %v8201_v51 = vpop.f32.mrb[22].mxu1  ;;  %v3110_v52 = vmax.f32 %v3086_v46, 0.0  ;;  %v3058_v4 = vmul.f32 %v7859_v50, %v10238_v21  ;;  %v2996_v8 = vpop.f32.mrb[23].mxu0 }
 0x2a0   : > { %v5958_v53 = vmax.f32 %v5934_v47, 0.0  ;;  %v5912_v6 = vmul.f32 %v8201_v51, %v10238_v21  ;;  %v5856_v10 = vpop.f32.mrb[23].mxu1  ;;  %v3109_v11 = vmax.f32 %v3085_v48, 0.0  ;;  %v3057_v56 = vmul.f32 %v10238_v21, %v2996_v8 }
 0x2a1   : > { %v5957_v54 = vmax.f32 %v5933_v49, 0.0  ;;  %v5911_v58 = vmul.f32 %v10238_v21, %v5856_v10  ;;  %3134 = vst [vmem:[%s10259_s21 + $0xa8] sm:$0xff] %v3110_v52  ;;  %v3088_v1 = vadd.f32 %v10245_v27, %v3058_v4 }
 0x2a2   : > { %5982 = vst [vmem:[%s10259_s21 + $0x168] sm:$0xff] %v5958_v53  ;;  %v5936_v2 = vadd.f32 %v10245_v27, %v5912_v6  ;;  %3133 = vst [vmem:[%s10259_s21 + $0xa0] sm:$0xff] %v3109_v11  ;;  %v3087_v62 = vadd.f32 %v10245_v27, %v3057_v56 }
 0x2a3   : > { %5981 = vst [vmem:[%s10259_s21 + $0x160] sm:$0xff] %v5957_v54  ;;  %v5935_v63 = vadd.f32 %v10245_v27, %v5911_v58  ;;  %v3112_v21 = vmax.f32 %v3088_v1, 0.0 }
 0x2a4   : > { %v5960_v22 = vmax.f32 %v5936_v2, 0.0  ;;  %v3111_v23 = vmax.f32 %v3087_v62, 0.0 }
 0x2a5   : > { %v5959_v57 = vmax.f32 %v5935_v63, 0.0  ;;  %3136 = vst [vmem:[%s10259_s21 + $0xb8] sm:$0xff] %v3112_v21 }
 0x2a6   : > { %5984 = vst [vmem:[%s10259_s21 + $0x178] sm:$0xff] %v5960_v22  ;;  %3135 = vst [vmem:[%s10259_s21 + $0xb0] sm:$0xff] %v3111_v23 }
 0x2a7   : > { %5983 = vst [vmem:[%s10259_s21 + $0x170] sm:$0xff] %v5959_v57 }
 0x2a8   : > { %8659 = shalt.err (!%p8656_p5)
}
 0x2a9   : > { %s8660_s13 = scalar_lea.hbm %s10394_s7, 6144  ;;  %s8664_s24 = scalar_lea.hbm %s10454_s4, 12288 }
 0x2aa   : > { %p8661_p6 = scmp.ne.s32.totalorder %s10394_s7, %s8660_s13  ;;  %p8665_p10 = scmp.lt.u32.totalorder %s10394_s7, %s10454_s4 }
 0x2ab   : > { %p8666_p11 = scmp.lt.u32.totalorder %s8664_s24, %s8660_s13  ;;  %p8668_p13 = scmp.lt.u32.totalorder %s8660_s13, %s10394_s7 }
 0x2ac   : > { %p8662_p7 = pnand %p8661_p6, %p8794_p4 }
 0x2ad   : > { %p8667_p12 = por %p8666_p11, %p8665_p10 }
 0x2ae   : > { %p8663_p9 = pneg %p8662_p7 }
 0x2af   : > { %p8669_p0 = por %p8668_p13, %p8667_p12 }
 0x2b1   : > { %p8670_p1 = pnand %p8669_p0, %p8663_p9 }
 0x2b3   : > { %8673 = shalt.err (!%p8670_p1)
}
 0x2b4   : > { %s8727_s21 = smov 128   ;;  %s8728_s30 = smov 8  }
 0x2b5   : > { %8589 = dma.vmem_to_hbm [thread:$0]  (%p8794_p4), %s10396_s5, 6144, %s10394_s7, %s10404_s8, %s8727_s21, %s8727_s21, %s8728_s30  }
 0x2b6 PF: > { %p8595_p2 = scmp.ge.s32.totalorder %s8724_s20, 2  ;;  %s6017_s18 = sand.u32 1, %s8704_s15  }
 0x2b7   : > { %s6018_s6 = scalar_lea.sflag [#allocation3], %s6017_s18 }
 0x2b8   : > { %p8592_p3 = pnand %p8595_p2, %p8801_p8 }
 0x2ba   : > { %8699 = dma.done.wait (!%p8592_p3), %s6018_s6, 6144  }
 0x2bb   : > { %8701 = vsyncadd (!%p8592_p3), %s6018_s6, 4294961152  ;;  %s17_s20 = sadd.s32 1, %s8724_s20   ;;  %s10682_s15 = smov %s8708_s16 }
 0x2bc   : > { %p14_p5 = scmp.ge.s32.totalorder %s17_s20, 4   ;;  %s10683_s16 = smov %s8712_s17 }
 0x2bd   : > { %s10684_s17 = smov %s8807_s28  ;;  %s10685_s18 = smov %s8720_s19 }
 0x2be   : > { %s10686_s19 = smov %s10688_s23  ;;  %16 = sbr.rel (!%p14_p5) target bundleno = 4 (0x4), region = 106 }
 0x2c5   :  { %6023 = vsyncpa [#allocation3], 1 }
 0x2c6   :  { %6025 = vsyncpa [#allocation3 + $0x1], 1 }

</bundles_post_ra>
